<compile_context>
chip_gen: v5e
topology: v5e:2x2
jax: 0.10.0
libtpu: 0.0.40
codegen_flags: <defaults>
</compile_context>

<pallas_src>
import functools

import jax
import jax.numpy as jnp
from jax.experimental import pallas as pl
from jax.experimental.pallas import tpu as pltpu


def _round_up(x, m):
    return ((x + m - 1) // m) * m


# ---------------------------------------------------------------------------
# Fat-K kernel (stride == 1, Cin < 128): build im2col patch in VMEM, one dot.
# ---------------------------------------------------------------------------
def _conv_bn_relu_fatk_kernel(x_ref, w_ref, b_ref, o_ref, patch_ref, *,
                              kh, kw, dilation, tile_h, w_out, cin,
                              in_tile_h, row_step, relu):
    # x_ref:     (1, rows, Wp, Cin)        bf16 (full padded image or strip)
    # w_ref:     (kh*kw*Cin, Cout_p)       bf16, BN scale folded
    # b_ref:     (1, Cout_p)               f32 folded BN/conv bias
    # o_ref:     (1, 1, m, Cout_p)         flat, lane-dense output block
    # patch_ref: (m, kh*kw*Cin)            bf16 VMEM scratch (im2col patch)
    m = tile_h * w_out

    if row_step == 0:
        strip = x_ref[0]                                # (rows, Wp, Cin)
    else:
        row0 = pl.program_id(1) * row_step
        if row_step % 8 == 0:
            row0 = pl.multiple_of(row0, 8)
        strip = x_ref[0, pl.ds(row0, in_tile_h), :, :]  # (in_tile_h, Wp, Cin)

    # Build the (m, kh*kw*Cin) im2col patch with plain slices + lane-offset
    # stores (no jnp.concatenate / lane-splitting reshapes).
    for di in range(kh):
        r0 = di * dilation
        rows = strip[r0:r0 + tile_h]                    # (tile_h, Wp, Cin)
        for dj in range(kw):
            c0 = dj * dilation
            tap = rows[:, c0:c0 + w_out, :].reshape(m, cin)
            k0 = (di * kw + dj) * cin
            patch_ref[:, k0:k0 + cin] = tap

    acc = jnp.dot(patch_ref[...], w_ref[...],
                  preferred_element_type=jnp.float32)   # (m, Cout_p) f32
    acc = acc + b_ref[...]
    if relu:
        acc = jnp.maximum(acc, 0.0)
    o_ref[0, 0] = acc.astype(o_ref.dtype)


# ---------------------------------------------------------------------------
# Per-tap kernel (Cin >= 128 or stride > 1): K=Cin dots, VMEM scratch acc.
# ---------------------------------------------------------------------------
def _conv_bn_relu_taps_kernel(x_ref, w_ref, b_ref, o_ref, acc_ref, *,
                              kh, kw, stride, dilation, tile_h, w_out, cin,
                              in_tile_h, row_step, relu):
    # x_ref: (1, rows, Wp, Cin); w_ref: (kh, kw, Cin, Cout_p); b_ref: (1, Cout_p)
    # o_ref: (1, 1, m, Cout_p);  acc_ref: (m, Cout_p) f32 VMEM scratch
    m = tile_h * w_out
    cout_p = o_ref.shape[-1]

    if row_step == 0:
        strip = x_ref[0]
    else:
        row0 = pl.program_id(1) * row_step
        if row_step % 8 == 0:
            row0 = pl.multiple_of(row0, 8)
        strip = x_ref[0, pl.ds(row0, in_tile_h), :, :]

    # Accumulator initialized with the folded bias (saves one epilogue pass).
    acc_ref[...] = jnp.broadcast_to(b_ref[...], (m, cout_p))

    for di in range(kh):
        for dj in range(kw):
            r0 = di * dilation
            c0 = dj * dilation
            if stride == 1:
                patch = strip[r0:r0 + tile_h, c0:c0 + w_out, :]
            else:
                # TODO(synk): decompose W into stride phases in the wrapper so
                # these strided slices become contiguous (perf only).
                patch = jax.lax.slice(
                    strip,
                    (r0, c0, 0),
                    (r0 + (tile_h - 1) * stride + 1,
                     c0 + (w_out - 1) * stride + 1,
                     cin),
                    (stride, stride, 1))
            acc_ref[...] += jnp.dot(patch.reshape(m, cin), w_ref[di, dj],
                                    preferred_element_type=jnp.float32)

    acc = acc_ref[...]
    if relu:
        acc = jnp.maximum(acc, 0.0)
    o_ref[0, 0] = acc.astype(o_ref.dtype)


# ---------------------------------------------------------------------------
# Wrapper
# ---------------------------------------------------------------------------
def basic_conv_forward(
    x_nchw,
    conv_weight,            # (Cout, Cin, KH, KW)  -- PyTorch layout
    bn_gamma=None,
    bn_beta=None,
    bn_running_mean=None,
    bn_running_var=None,
    conv_bias=None,
    *,
    stride=1,
    padding=0,
    dilation=1,
    groups=1,
    relu=True,
    bn=True,
    eps=1e-5,
    target_block_rows=256,                 # target m = rows of per-step matmul
    compute_dtype=jnp.bfloat16,
    resident_image_vmem_bytes=8 * 1024 * 1024,
):
    if groups != 1:
        # TODO(synk): grouped convolution not supported in this kernel.
        raise NotImplementedError("groups != 1 is not supported")

    n, cin, h, w = x_nchw.shape
    cout, cin_w, kh, kw = conv_weight.shape
    assert cin_w == cin
    out_dtype = x_nchw.dtype

    h_out = (h + 2 * padding - dilation * (kh - 1) - 1) // stride + 1
    w_out = (w + 2 * padding - dilation * (kw - 1) - 1) // stride + 1

    # --- Fold BN (eval mode) + optional conv bias into scale / bias ---------
    cb = (jnp.zeros((cout,), jnp.float32) if conv_bias is None
          else conv_bias.astype(jnp.float32))
    if bn:
        inv_std = jax.lax.rsqrt(bn_running_var.astype(jnp.float32) + eps)
        scale = bn_gamma.astype(jnp.float32) * inv_std
        bias = bn_beta.astype(jnp.float32) + scale * (
            cb - bn_running_mean.astype(jnp.float32))
    else:
        scale = jnp.ones((cout,), jnp.float32)
        bias = cb

    # --- Output channels padded for lane-dense stores / full MXU N tiles ----
    cout_align = 256 if cout > 128 else 128      # v6e/v7x MXU is 256 wide
    cout_p = _round_up(cout, cout_align)

    # Weight: (Cout,Cin,KH,KW) -> (KH,KW,Cin,Cout_p), BN scale folded, bf16.
    w_hwio = jnp.transpose(
        conv_weight.astype(jnp.float32) * scale[:, None, None, None],
        (2, 3, 1, 0))                            # (KH, KW, Cin, Cout)
    w_hwio = jnp.pad(
        w_hwio, ((0, 0), (0, 0), (0, 0), (0, cout_p - cout))
    ).astype(compute_dtype)
    bias_p = jnp.pad(bias, (0, cout_p - cout)).reshape(1, cout_p)

    # --- Row tiling: m = tile_h * w_out ~ target, multiple of 8 if possible -
    tile_h = max(1, min(h_out, max(1, target_block_rows // max(w_out, 1))))
    while tile_h < h_out and (tile_h * w_out) % 8 != 0:
        tile_h += 1
    if n == 1 and tile_h >= h_out and h_out > 1:
        tile_h = -(-h_out // 2)                  # feed both v7x TensorCores
    num_t = -(-h_out // tile_h)
    h_out_p = num_t * tile_h
    m = tile_h * w_out

    in_tile_h = (tile_h - 1) * stride + (kh - 1) * dilation + 1
    h_in_needed = (h_out_p - 1) * stride + (kh - 1) * dilation + 1

    # --- NCHW -> NHWC, spatial zero-pad, cast to compute dtype --------------
    x_nhwc = jnp.transpose(x_nchw, (0, 2, 3, 1)).astype(compute_dtype)
    pad_bottom = padding + max(0, h_in_needed - (h + 2 * padding))
    x_pad = jnp.pad(
        x_nhwc, ((0, 0), (padding, pad_bottom), (padding, padding), (0, 0)))
    wp = w + 2 * padding
    h_pad = h + padding + pad_bottom

    use_fatk = (stride == 1) and (cin < 128)
    k_total = kh * kw * cin

    # --- Resident full image vs. halo row-strips (VMEM footprint estimate) --
    bpe = jnp.dtype(compute_dtype).itemsize
    out_bpe = jnp.dtype(out_dtype).itemsize
    sub_tile = max(8, 32 // bpe)
    row_bytes = _round_up(wp, sub_tile) * _round_up(max(cin, 1), 128) * bpe
    img_vmem = h_pad * row_bytes
    strip_vmem = in_tile_h * row_bytes

    resident = img_vmem <= resident_image_vmem_bytes
    if resident:
        x_in = x_pad                              # (n, h_pad, wp, cin)
        x_rows = h_pad
        # num_t == 1 -> row offset is always 0, keep the slice fully static.
        row_step = tile_h * stride if num_t > 1 else 0
        x_index = lambda b, t: (b, 0, 0, 0)       # block constant across t
        x_block_vmem = img_vmem
    else:
        # Fallback for very large images: duplicated-halo row strips.
        # TODO(synk): a manual-DMA row-window path (memory_space=pl.ANY) would
        # avoid this extra HBM copy of the activation.
        x_in = jnp.stack(
            [x_pad[:, t * tile_h * stride: t * tile_h * stride + in_tile_h]
             for t in range(num_t)],
            axis=1,
        ).reshape(n * num_t, in_tile_h, wp, cin)
        x_rows = in_tile_h
        row_step = 0

        def x_index(b, t):
            return (b * num_t + t, 0, 0, 0)

        x_block_vmem = strip_vmem

    x_spec = pl.BlockSpec((1, x_rows, wp, cin), x_index)
    b_spec = pl.BlockSpec((1, cout_p), lambda b, t: (0, 0))
    out_spec = pl.BlockSpec((1, 1, m, cout_p), lambda b, t: (b, t, 0, 0))

    if use_fatk:
        w_in = w_hwio.reshape(k_total, cout_p)
        w_spec = pl.BlockSpec((k_total, cout_p), lambda b, t: (0, 0))
        scratch = [pltpu.VMEM((m, k_total), compute_dtype)]
        kernel = functools.partial(
            _conv_bn_relu_fatk_kernel, kh=kh, kw=kw, dilation=dilation,
            tile_h=tile_h, w_out=w_out, cin=cin, in_tile_h=in_tile_h,
            row_step=row_step, relu=relu)
        scratch_vmem = m * _round_up(k_total, 128) * bpe
        w_vmem = _round_up(k_total, sub_tile) * cout_p * bpe
    else:
        w_in = w_hwio                             # (kh, kw, cin, cout_p)
        w_spec = pl.BlockSpec((kh, kw, cin, cout_p),
                              lambda b, t: (0, 0, 0, 0))
        scratch = [pltpu.VMEM((m, cout_p), jnp.float32)]
        kernel = functools.partial(
            _conv_bn_relu_taps_kernel, kh=kh, kw=kw, stride=stride,
            dilation=dilation, tile_h=tile_h, w_out=w_out, cin=cin,
            in_tile_h=in_tile_h, row_step=row_step, relu=relu)
        scratch_vmem = m * cout_p * 4
        w_vmem = kh * kw * _round_up(cin, sub_tile) * cout_p * bpe

    # --- VMEM budget (cap ~40 MB so sizes still fit v7x's 64 MiB VMEM) ------
    out_block_vmem = m * cout_p * out_bpe
    needed = (2 * (x_block_vmem + w_vmem + cout_p * 4 + out_block_vmem)
              + scratch_vmem + (2 << 20))
    vmem_limit = int(max(min(2 * needed, 40 << 20),
                         needed + (2 << 20),
                         16 << 20))

    flops = 2 * n * num_t * m * k_total * cout_p
    bytes_accessed = int(x_in.size * bpe + w_hwio.size * bpe + cout_p * 4
                         + n * num_t * m * cout_p * out_bpe)

    out_p = pl.pallas_call(
        kernel,
        out_shape=jax.ShapeDtypeStruct((n, num_t, m, cout_p), out_dtype),
        grid=(n, num_t),
        in_specs=[x_spec, w_spec, b_spec],
        out_specs=out_spec,
        scratch_shapes=scratch,
        compiler_params=pltpu.CompilerParams(
            dimension_semantics=("parallel", "parallel"),
            vmem_limit_bytes=vmem_limit,
        ),
        cost_estimate=pl.CostEstimate(
            flops=flops, transcendentals=0, bytes_accessed=bytes_accessed),
    )(x_in, w_in, bias_p)

    out = out_p.reshape(n, h_out_p, w_out, cout_p)[:, :h_out, :, :cout]
    return jnp.transpose(out, (0, 3, 1, 2))       # back to NCHW


# ---------------------------------------------------------------------------
# Pure-JAX reference (for correctness check)
# ---------------------------------------------------------------------------
def _reference(x, w, gamma, beta, mean, var, *, stride, padding, dilation,
               eps=1e-5):
    y = jax.lax.conv_general_dilated(
        x, w,
        window_strides=(stride, stride),
        padding=((padding, padding), (padding, padding)),
        rhs_dilation=(dilation, dilation),
        dimension_numbers=("NCHW", "OIHW", "NCHW"),
    )
    inv_std = 1.0 / jnp.sqrt(var + eps)
    y = y * (gamma * inv_std)[None, :, None, None] + (
        beta - mean * gamma * inv_std)[None, :, None, None]
    return jnp.maximum(y, 0.0)


if __name__ == "__main__":
    # BasicConv(in_planes=4, out_planes=8, kernel_size=3, stride=1, padding=1)
    N, Cin, H, W = 2, 4, 16, 16
    Cout, KH, KW = 8, 3, 3
    stride, padding, dilation = 1, 1, 1

    key = jax.random.PRNGKey(0)
    kx, kw_, kg, kb, km, kv = jax.random.split(key, 6)

    x = jax.random.normal(kx, (N, Cin, H, W), jnp.float32)
    conv_w = jax.random.normal(kw_, (Cout, Cin, KH, KW), jnp.float32) * 0.1
    gamma = 1.0 + 0.1 * jax.random.normal(kg, (Cout,), jnp.float32)
    beta = 0.1 * jax.random.normal(kb, (Cout,), jnp.float32)
    running_mean = 0.1 * jax.random.normal(km, (Cout,), jnp.float32)
    running_var = jnp.abs(1.0 + 0.1 * jax.random.normal(kv, (Cout,), jnp.float32))

    out = basic_conv_forward(
        x, conv_w, gamma, beta, running_mean, running_var,
        stride=stride, padding=padding, dilation=dilation,
        relu=True, bn=True,
    )
    out = jax.block_until_ready(out)

    ref = _reference(
        x, conv_w, gamma, beta, running_mean, running_var,
        stride=stride, padding=padding, dilation=dilation,
    )
    assert out.shape == (N, Cout, H, W), out.shape
    max_err = float(jnp.max(jnp.abs(out - ref)))
    # bf16 MXU inputs with f32 accumulation -> tolerance sized for bf16 rounding.
    assert jnp.allclose(out, ref, atol=5e-2, rtol=5e-2), max_err
    print("KERNEL_OK")
</pallas_src>

<mosaic_0001>
module attributes {stable_mosaic.version = 11 : i64} {
  func.func @_conv_bn_relu_fatk_kernel(%arg0: i32, %arg1: i32, %arg2: memref<1x18x18x4xbf16, #tpu.memory_space<vmem>>, %arg3: memref<36x128xbf16, #tpu.memory_space<vmem>>, %arg4: memref<1x128xf32, #tpu.memory_space<vmem>>, %arg5: memref<1x1x256x128xf32, #tpu.memory_space<vmem>>, %arg6: memref<256x36xbf16, #tpu.memory_space<vmem>>) attributes {dimension_semantics = [#tpu.dimension_semantics<parallel>, #tpu.dimension_semantics<parallel>], iteration_bounds = array<i64: 2, 1>, scalar_prefetch = 0 : i64, scratch_operands = 1 : i64, tpu.core_type = #tpu.core_type<tc>, window_params = [{transform_indices = @transform_0, window_bounds = array<i64: 1, 18, 18, 4>}, {pipeline_mode = #tpu.pipeline_mode<synchronous>, transform_indices = @transform_1, window_bounds = array<i64: 36, 128>}, {pipeline_mode = #tpu.pipeline_mode<synchronous>, transform_indices = @transform_2, window_bounds = array<i64: 1, 128>}, {transform_indices = @transform_3, window_bounds = array<i64: 1, 1, 256, 128>}]} {
    %c0 = arith.constant 0 : index
    %c0_0 = arith.constant 0 : index
    %c0_1 = arith.constant 0 : index
    %c0_2 = arith.constant 0 : index
    %0 = vector.load %arg2[%c0, %c0_0, %c0_1, %c0_2] : memref<1x18x18x4xbf16, #tpu.memory_space<vmem>>, vector<1x18x18x4xbf16>
    %1 = vector.shape_cast %0 : vector<1x18x18x4xbf16> to vector<18x18x4xbf16>
    %2 = vector.extract_strided_slice %1 {offsets = [0, 0, 0], sizes = [16, 18, 4], strides = [1, 1, 1]} : vector<18x18x4xbf16> to vector<16x18x4xbf16>
    %3 = vector.extract_strided_slice %2 {offsets = [0, 0, 0], sizes = [16, 16, 4], strides = [1, 1, 1]} : vector<16x18x4xbf16> to vector<16x16x4xbf16>
    %4 = vector.shape_cast %3 : vector<16x16x4xbf16> to vector<256x4xbf16>
    %c0_3 = arith.constant 0 : index
    %c0_4 = arith.constant 0 : index
    %5 = vector.load %arg6[%c0_3, %c0_4] : memref<256x36xbf16, #tpu.memory_space<vmem>>, vector<256x4xbf16>
    tpu.vector_store %arg6[%c0_3, %c0_4], %4 {strides = array<i32>} : memref<256x36xbf16, #tpu.memory_space<vmem>>, vector<256x4xbf16>,
    %6 = vector.extract_strided_slice %2 {offsets = [0, 1, 0], sizes = [16, 16, 4], strides = [1, 1, 1]} : vector<16x18x4xbf16> to vector<16x16x4xbf16>
    %7 = vector.shape_cast %6 : vector<16x16x4xbf16> to vector<256x4xbf16>
    %c0_5 = arith.constant 0 : index
    %c4 = arith.constant 4 : index
    %8 = vector.load %arg6[%c0_5, %c4] : memref<256x36xbf16, #tpu.memory_space<vmem>>, vector<256x4xbf16>
    tpu.vector_store %arg6[%c0_5, %c4], %7 {strides = array<i32>} : memref<256x36xbf16, #tpu.memory_space<vmem>>, vector<256x4xbf16>,
    %9 = vector.extract_strided_slice %2 {offsets = [0, 2, 0], sizes = [16, 16, 4], strides = [1, 1, 1]} : vector<16x18x4xbf16> to vector<16x16x4xbf16>
    %10 = vector.shape_cast %9 : vector<16x16x4xbf16> to vector<256x4xbf16>
    %c0_6 = arith.constant 0 : index
    %c8 = arith.constant 8 : index
    %11 = vector.load %arg6[%c0_6, %c8] : memref<256x36xbf16, #tpu.memory_space<vmem>>, vector<256x4xbf16>
    tpu.vector_store %arg6[%c0_6, %c8], %10 {strides = array<i32>} : memref<256x36xbf16, #tpu.memory_space<vmem>>, vector<256x4xbf16>,
    %12 = vector.extract_strided_slice %1 {offsets = [1, 0, 0], sizes = [16, 18, 4], strides = [1, 1, 1]} : vector<18x18x4xbf16> to vector<16x18x4xbf16>
    %13 = vector.extract_strided_slice %12 {offsets = [0, 0, 0], sizes = [16, 16, 4], strides = [1, 1, 1]} : vector<16x18x4xbf16> to vector<16x16x4xbf16>
    %14 = vector.shape_cast %13 : vector<16x16x4xbf16> to vector<256x4xbf16>
    %c0_7 = arith.constant 0 : index
    %c12 = arith.constant 12 : index
    %15 = vector.load %arg6[%c0_7, %c12] : memref<256x36xbf16, #tpu.memory_space<vmem>>, vector<256x4xbf16>
    tpu.vector_store %arg6[%c0_7, %c12], %14 {strides = array<i32>} : memref<256x36xbf16, #tpu.memory_space<vmem>>, vector<256x4xbf16>,
    %16 = vector.extract_strided_slice %12 {offsets = [0, 1, 0], sizes = [16, 16, 4], strides = [1, 1, 1]} : vector<16x18x4xbf16> to vector<16x16x4xbf16>
    %17 = vector.shape_cast %16 : vector<16x16x4xbf16> to vector<256x4xbf16>
    %c0_8 = arith.constant 0 : index
    %c16 = arith.constant 16 : index
    %18 = vector.load %arg6[%c0_8, %c16] : memref<256x36xbf16, #tpu.memory_space<vmem>>, vector<256x4xbf16>
    tpu.vector_store %arg6[%c0_8, %c16], %17 {strides = array<i32>} : memref<256x36xbf16, #tpu.memory_space<vmem>>, vector<256x4xbf16>,
    %19 = vector.extract_strided_slice %12 {offsets = [0, 2, 0], sizes = [16, 16, 4], strides = [1, 1, 1]} : vector<16x18x4xbf16> to vector<16x16x4xbf16>
    %20 = vector.shape_cast %19 : vector<16x16x4xbf16> to vector<256x4xbf16>
    %c0_9 = arith.constant 0 : index
    %c20 = arith.constant 20 : index
    %21 = vector.load %arg6[%c0_9, %c20] : memref<256x36xbf16, #tpu.memory_space<vmem>>, vector<256x4xbf16>
    tpu.vector_store %arg6[%c0_9, %c20], %20 {strides = array<i32>} : memref<256x36xbf16, #tpu.memory_space<vmem>>, vector<256x4xbf16>,
    %22 = vector.extract_strided_slice %1 {offsets = [2, 0, 0], sizes = [16, 18, 4], strides = [1, 1, 1]} : vector<18x18x4xbf16> to vector<16x18x4xbf16>
    %23 = vector.extract_strided_slice %22 {offsets = [0, 0, 0], sizes = [16, 16, 4], strides = [1, 1, 1]} : vector<16x18x4xbf16> to vector<16x16x4xbf16>
    %24 = vector.shape_cast %23 : vector<16x16x4xbf16> to vector<256x4xbf16>
    %c0_10 = arith.constant 0 : index
    %c24 = arith.constant 24 : index
    %25 = vector.load %arg6[%c0_10, %c24] : memref<256x36xbf16, #tpu.memory_space<vmem>>, vector<256x4xbf16>
    tpu.vector_store %arg6[%c0_10, %c24], %24 {strides = array<i32>} : memref<256x36xbf16, #tpu.memory_space<vmem>>, vector<256x4xbf16>,
    %26 = vector.extract_strided_slice %22 {offsets = [0, 1, 0], sizes = [16, 16, 4], strides = [1, 1, 1]} : vector<16x18x4xbf16> to vector<16x16x4xbf16>
    %27 = vector.shape_cast %26 : vector<16x16x4xbf16> to vector<256x4xbf16>
    %c0_11 = arith.constant 0 : index
    %c28 = arith.constant 28 : index
    %28 = vector.load %arg6[%c0_11, %c28] : memref<256x36xbf16, #tpu.memory_space<vmem>>, vector<256x4xbf16>
    tpu.vector_store %arg6[%c0_11, %c28], %27 {strides = array<i32>} : memref<256x36xbf16, #tpu.memory_space<vmem>>, vector<256x4xbf16>,
    %29 = vector.extract_strided_slice %22 {offsets = [0, 2, 0], sizes = [16, 16, 4], strides = [1, 1, 1]} : vector<16x18x4xbf16> to vector<16x16x4xbf16>
    %30 = vector.shape_cast %29 : vector<16x16x4xbf16> to vector<256x4xbf16>
    %c0_12 = arith.constant 0 : index
    %c32 = arith.constant 32 : index
    %31 = vector.load %arg6[%c0_12, %c32] : memref<256x36xbf16, #tpu.memory_space<vmem>>, vector<256x4xbf16>
    tpu.vector_store %arg6[%c0_12, %c32], %30 {strides = array<i32>} : memref<256x36xbf16, #tpu.memory_space<vmem>>, vector<256x4xbf16>,
    %c0_13 = arith.constant 0 : index
    %c0_14 = arith.constant 0 : index
    %32 = vector.load %arg6[%c0_13, %c0_14] : memref<256x36xbf16, #tpu.memory_space<vmem>>, vector<256x36xbf16>
    %c0_15 = arith.constant 0 : index
    %c0_16 = arith.constant 0 : index
    %33 = vector.load %arg3[%c0_15, %c0_16] : memref<36x128xbf16, #tpu.memory_space<vmem>>, vector<36x128xbf16>
    %cst = arith.constant dense<0.000000e+00> : vector<256x128xf32>
    %34 = tpu.matmul %32, %33, %cst {dimension_numbers = #tpu.dot_dimension_numbers<[1], [0], [0], [1], [0, 0, 1, 1], [], []>} : vector<256x36xbf16>, vector<36x128xbf16>, vector<256x128xf32> -> vector<256x128xf32>
    %c0_17 = arith.constant 0 : index
    %c0_18 = arith.constant 0 : index
    %35 = vector.load %arg4[%c0_17, %c0_18] : memref<1x128xf32, #tpu.memory_space<vmem>>, vector<1x128xf32>
    %36 = vector.broadcast %35 : vector<1x128xf32> to vector<256x128xf32>
    %37 = arith.addf %34, %36 : vector<256x128xf32>
    %cst_19 = arith.constant 0.000000e+00 : f32
    %38 = vector.broadcast %cst_19 : f32 to vector<256x128xf32>
    %39 = arith.maximumf %37, %38 : vector<256x128xf32>
    %c0_20 = arith.constant 0 : index
    %c0_21 = arith.constant 0 : index
    %c0_22 = arith.constant 0 : index
    %c0_23 = arith.constant 0 : index
    %40 = vector.load %arg5[%c0_20, %c0_21, %c0_22, %c0_23] : memref<1x1x256x128xf32, #tpu.memory_space<vmem>>, vector<1x1x256x128xf32>
    %41 = vector.shape_cast %40 : vector<1x1x256x128xf32> to vector<256x128xf32>
    %42 = vector.shape_cast %39 : vector<256x128xf32> to vector<1x1x256x128xf32>
    tpu.vector_store %arg5[%c0_20, %c0_21, %c0_22, %c0_23], %42 {strides = array<i32>} : memref<1x1x256x128xf32, #tpu.memory_space<vmem>>, vector<1x1x256x128xf32>,
    return
  }
  func.func @transform_0(%arg0: i32, %arg1: i32) -> (i32, i32, i32, i32) {
    %c0_i32 = arith.constant 0 : i32
    %c0_i32_0 = arith.constant 0 : i32
    %c0_i32_1 = arith.constant 0 : i32
    %c0_i32_2 = arith.constant 0 : i32
    return %arg0, %c0_i32, %c0_i32_0, %c0_i32_1 : i32, i32, i32, i32
  }
  func.func @transform_1(%arg0: i32, %arg1: i32) -> (i32, i32) {
    %c0_i32 = arith.constant 0 : i32
    %c0_i32_0 = arith.constant 0 : i32
    %c0_i32_1 = arith.constant 0 : i32
    return %c0_i32, %c0_i32_0 : i32, i32
  }
  func.func @transform_2(%arg0: i32, %arg1: i32) -> (i32, i32) {
    %c0_i32 = arith.constant 0 : i32
    %c0_i32_0 = arith.constant 0 : i32
    %c0_i32_1 = arith.constant 0 : i32
    return %c0_i32, %c0_i32_0 : i32, i32
  }
  func.func @transform_3(%arg0: i32, %arg1: i32) -> (i32, i32, i32, i32) {
    %c0_i32 = arith.constant 0 : i32
    %c0_i32_0 = arith.constant 0 : i32
    %c0_i32_1 = arith.constant 0 : i32
    return %arg0, %arg1, %c0_i32, %c0_i32_0 : i32, i32, i32, i32
  }
}

</mosaic_0001>

<bundles_post_ra>
// kernel: tpu_custom_call.1
= control target key start
LH: loop header
LB: loop body
LE: loop exit
PB: predicated region body
PF: predicated region fallthrough
CT: control target
= control target key end

     0   :  { %8 = vsyncpa [#allocation4], 0  ;;  %s4282_s0 = inlined_call_operand.vmem [shape: bf16[2,18,18,4], index: 0, kind: input, shape index: {}]   ;;  %s4283_s1 = inlined_call_operand.vmem [shape: bf16[36,128], index: 1, kind: input, shape index: {}]   ;;  %s4284_s2 = inlined_call_operand.vmem [shape: f32[1,128], index: 2, kind: input, shape index: {}]   ;;  %s4285_s3 = inlined_call_operand.hbm [shape: f32[2,1,256,128], index: 3, kind: output, shape index: {}]  }
   0x1   :  { %10 = vsyncpa [#allocation4 + $0x1], 0  ;;  %s2675_s12 = smov 0   ;;  %s2677_s13 = smov 0  }
   0x2   :  { %s2679_s14 = smov 0   ;;  %s2681_s15 = smov 0  }
   0x3   :  { %s2683_s16 = smov 0   ;;  %s2685_s17 = smov 0  }
   0x4 LB: > { %s2354_s18 = sadd.s32 4294967295, %s2644_s17   ;;  %s2355_s19 = sadd.s32 4294967294, %s2644_s17   ;;  %s2644_s17 = sphi %s2685_s17, %s16_s17   ;;  %s2640_s16 = sphi %s2683_s16, %s4539_s16   ;;  %s2636_s15 = sphi %s2681_s15, %s4538_s15   ;;  %s2632_s14 = sphi %s2679_s14, %s4537_s14   ;;  %s2628_s13 = sphi %s2677_s13, %s4536_s13   ;;  %s2624_s12 = sphi %s2675_s12, %s4535_s12  }
   0x5   : > { %s28_s20 = sadd.s32 1, %s2640_s16  ;;  %s105_s21 = sadd.s32 1, %s2632_s14 }
   0x6   : > { %p30_p0 = scmp.ge.s32.totalorder %s28_s20, 2  ;;  %p115_p1 = scmp.ne.s32.totalorder %s2632_s14, %s2628_s13 }
   0x7   : > { %p116_p2 = scmp.eq.s32.totalorder %s2354_s18, 1  ;;  %p121_p3 = scmp.ne.s32.totalorder %s2628_s13, %s2624_s12 }
   0x8   : > { %s4541_s20 = smov (%p30_p0, %s28_s20), 0  ;;  %p122_p5 = scmp.eq.s32.totalorder %s2355_s19, 1 }
   0x9   : > { %p2715_p4 = por %p116_p2, %p115_p1  ;;  %s100_s23 = ssub.s32 %s2640_s16, %s4541_s20 }
   0xa   : > { %p2358_p6 = scmp.ge.s32.totalorder %s2644_s17, 1  ;;  %p103_p7 = scmp.eq.s32.totalorder %s100_s23, 0 }
   0xb   : > { %p2722_p8 = por %p122_p5, %p121_p3  ;;  %p154_p9 = scmp.lt.s32.totalorder %s2644_s17, 3 }
   0xc   : > { %s2728_s25 = scalar_select %p103_p7, %s2632_s14, %s105_s21  }
   0xd   : > { %p155_p10 = pnand %p2358_p6, %p154_p9 }
   0xf   : > { %158 = sbr.rel (%p155_p10) target bundleno = 983 (0x3d7), region = 32 }
  0x14   : > { %p178_p11 = scmp.lt.s32.totalorder %s2636_s15, 1  ;;  %vm271_vm0 = vsmask.f32 3328  ;;  %vm272_vm1 = vsmask.f32 7440  ;;  %v4388_v27 = vmov 0 }
  0x15   : > { %vm2771_vm2 = vmor %vm271_vm0, %vm272_vm1  ;;  %s2646_s4 = smov 4   ;;  %vm835_vm3 = vcmask 1042432   ;;  %vm836_vm4 = vcmask 1046532   ;;  %vm238_vm5 = vcmask 27648   ;;  %s2647_s5 = smov 8   ;;  %vm754_vm7 = vcmask 60448  }
  0x16   : > { %s179_s26 = scalar_select %p178_p11, %s2636_s15, 1  ;;  %v4389_v27 = vsel %vm2771_vm2, 4294967295, %v4388_v27  ;;  %vm3158_vm6 = vmor %vm835_vm3, %vm836_vm4  ;;  %vm1046_vm8 = vcmask 93248   ;;  %vm1177_vm9 = vcmask 126048   ;;  %vm1330_vm10 = vcmask 158848  }
  0x17   : > { %4390 = vst [vmem:[#allocation6_spill] sm:$0xff] %v4389_v27  ;;  %s2648_s6 = smov 12   ;;  %s2649_s7 = smov 16   ;;  %vm1467_vm11 = vcmask 191648   ;;  %vm1598_vm12 = vcmask 224448   ;;  %vm2106_vm13 = vcmask 1041408  }
  0x18   : > { %s2500_s27 = smul.u32 216, %s179_s26  ;;  %s2650_s8 = smov 20   ;;  %vm1751_vm14 = vcmask 257248   ;;  %vm1888_vm15 = vcmask 290048   ;;  %vm2057_vm0 = vcmask 293888  }
  0x19   : > { %s2651_s9 = smov 24   ;;  %s2652_s10 = smov 28  }
  0x1a   : > { %s2735_s30 = scalar_lea.vmem %s4282_s0, %s2500_s27  ;;  %s2653_s11 = smov 32  }
  0x1b   : > { %v2738_v0 = vld [vmem:[%s2735_s30 + $0xc] sm:$0xf]  ;;  %v2741_v1 = vld [vmem:[%s2735_s30 + $0x10] sm:$0xf]  ;;  %v2744_v2 = vld [vmem:[%s2735_s30] sm:$0xf] }
  0x1c   : > { %v299_v3 = vshrl.u32 %v2738_v0, 16  ;;  %v302_v4 = vshll.u32 %v2738_v0, 16  ;;  %v308_v5 = vshll.u32 %v2741_v1, 16  ;;  %v2750_v6 = vld [vmem:[%s2735_s30 + $0x4] sm:$0xf]  ;;  %v275_v7 = vshrl.u32 %v2744_v2, 16 }
  0x1d   : > { %v278_v8 = vshll.u32 %v2744_v2, 16  ;;  %v284_v9 = vshll.u32 %v2750_v6, 16  ;;  %v2756_v10 = vld [vmem:[%s2735_s30 + $0x14] sm:$0x1]  ;;  %v312_v11 = vshrl.u32 %v2741_v1, 16  ;;  %v288_v12 = vshrl.u32 %v2750_v6, 16 }
  0x1e   : > { %v301_v13 = vrot.slane %v299_v3, 4  ;;  %v304_v14 = vrot.slane %v302_v4, 5  ;;  %v310_v15 = vrot.slane %v308_v5, 5  ;;  %v277_v16 = vrot.slane %v275_v7, 4  ;;  %v2761_v17 = vld [vmem:[%s2735_s30 + $0x8] sm:$0x1] }
  0x1f   : > { %v280_v18 = vrot.slane %v278_v8, 5  ;;  %v286_v19 = vrot.slane %v284_v9, 5  ;;  %v314_v20 = vrot.slane %v312_v11, 4  ;;  %v318_v21 = vshll.u32 %v2756_v10, 16  ;;  %v2765_v22 = vld [vmem:[%s2735_s30 + $0x28] sm:$0xf] }
  0x20   : > { %v305_v23 = vor.u32 %v304_v14, %v301_v13  ;;  %v290_v24 = vrot.slane %v288_v12, 4  ;;  %v294_v25 = vshll.u32 %v2761_v17, 16  ;;  %v356_v26 = vshll.u32 %v2765_v22, 16  ;;  %v2777_v31 = vld [vmem:[%s2735_s30 + $0x24] sm:$0xf]  ;;  %s175_s28 = sand.u32 1, %s2628_s13  }
  0x21   : > { %v281_v28 = vor.u32 %v280_v18, %v277_v16  ;;  %v315_v29 = vor.u32 %v314_v20, %v310_v15  ;;  %v360_v30 = vshrl.u32 %v2765_v22, 16  ;;  %v320_v35 = vrot.slane %v318_v21, 5  ;;  %v2780_v37 = vld [vmem:[%s2735_s30 + $0x18] sm:$0xf]  ;;  %v2791_v42 = vld [vmem:[%s2735_s30 + $0x1c] sm:$0xf] }
  0x22   : > { %v306_v32 = vrot.slane %v305_v23, 4  ;;  %v291_v33 = vor.u32 %v290_v24, %v286_v19  ;;  %v296_v36 = vrot.slane %v294_v25, 5  ;;  %v2786_v39 = vrot.slane %v356_v26, 5  ;;  %v2798_v46 = vld [vmem:[%s2735_s30 + $0x2c] sm:$0x1]  ;;  %s2586_s27 = scalar_lea.hbm %s4285_s3, 512 }
  0x23   : > { %v282_v34 = vrot.slane %v281_v28, 4  ;;  %v347_v40 = vshrl.u32 %v2777_v31, 16  ;;  %v350_v41 = vshll.u32 %v2777_v31, 16  ;;  %v316_v44 = vrot.slane %v315_v29, 4  ;;  %v2805_v53 = vld [vmem:[%s2735_s30 + $0x3c] sm:$0xf] }
  0x24   : > { %v2784_v38 = vsel %vm2771_vm2, %v306_v32, %v310_v15  ;;  %v292_v45 = vrot.slane %v291_v33, 4  ;;  %v362_v47 = vrot.slane %v360_v30, 4  ;;  %v323_v50 = vshrl.u32 %v2780_v37, 16  ;;  %v2809_v56 = vld [vmem:[%s2735_s30 + $0x34] sm:$0xf] }
  0x25   : > { %4391 = vst [vmem:[#allocation7_spill] sm:$0xff] %v2784_v38  ;;  %662 = vrot.lane.b32.xlu1 %v2784_v38, %s2646_s4  ;;  %v287_v43 = vsel %vm2771_vm2, %v282_v34, %v286_v19  ;;  %v349_v48 = vrot.slane %v347_v40, 4  ;;  %v352_v49 = vrot.slane %v350_v41, 5  ;;  %v326_v51 = vshll.u32 %v2780_v37, 16  ;;  %v2821_v4 = vld [vmem:[%s2735_s30 + $0x20] sm:$0x1] }
  0x26   : > { %658 = vrot.lane.b32.xlu0 %v287_v43, %s2646_s4  ;;  %v332_v52 = vshll.u32 %v2791_v42, 16  ;;  %v366_v54 = vshll.u32 %v2798_v46, 16  ;;  %v325_v55 = vrot.slane %v323_v50, 4  ;;  %v2813_v57 = vsel %vm2771_vm2, %v316_v44, %v320_v35  ;;  %v2830_v16 = vld [vmem:[%s2735_s30 + $0x4c] sm:$0xf] }
  0x27   : > { %4392 = vst [vmem:[#allocation8_spill] sm:$0xff] %v2813_v57  ;;  %v297_v58 = vsel %vm2771_vm2, %v292_v45, %v296_v36  ;;  %v363_v59 = vor.u32 %v362_v47, %v2786_v39  ;;  %v328_v60 = vrot.slane %v326_v51, 5  ;;  %v353_v61 = vor.u32 %v352_v49, %v349_v48  ;;  %v2834_v19 = vld [vmem:[%s2735_s30 + $0x40] sm:$0xf]  ;;  %v2841_v24 = vld [vmem:[%s2735_s30 + $0x38] sm:$0x1] }
  0x28   : > { %v334_v62 = vrot.slane %v332_v52, 5  ;;  %v395_v63 = vshrl.u32 %v2805_v53, 16  ;;  %v398_v3 = vshll.u32 %v2805_v53, 16  ;;  %v380_v7 = vshll.u32 %v2809_v56, 16  ;;  %v2844_v29 = vld [vmem:[%s2735_s30 + $0x30] sm:$0xf] }
  0x29   : > { %v329_v5 = vor.u32 %v328_v60, %v325_v55  ;;  %v384_v8 = vshrl.u32 %v2809_v56, 16  ;;  %v336_v9 = vshrl.u32 %v2791_v42, 16  ;;  %v368_v11 = vrot.slane %v366_v54, 5  ;;  %v2851_v33 = vld [vmem:[%s2735_s30 + $0x48] sm:$0xf] }
  0x2a   : > { %v364_v12 = vrot.slane %v363_v59, 4  ;;  %v342_v15 = vshll.u32 %v2821_v4, 16  ;;  %v354_v18 = vrot.slane %v353_v61, 4  ;;  %v397_v20 = vrot.slane %v395_v63, 4  ;;  %v3037_v38 = vld [vmem:[%s2735_s30 + $0xa8] sm:$0xf] }
  0x2b   : > { %v330_v13 = vrot.slane %v329_v5, 4  ;;  %v338_v14 = vrot.slane %v336_v9, 4  ;;  %v400_v21 = vrot.slane %v398_v3, 5  ;;  %v382_v25 = vrot.slane %v380_v7, 5  ;;  %v2880_v7 = vld [vmem:[%s2735_s30 + $0x60] sm:$0xf] }
  0x2c   : > { %v386_v26 = vrot.slane %v384_v8, 4  ;;  %v428_v30 = vshll.u32 %v2830_v16, 16  ;;  %v432_v32 = vshrl.u32 %v2830_v16, 16  ;;  %v2855_v34 = vsel %vm2771_vm2, %v364_v12, %v368_v11  ;;  %v2886_v11 = vld [vmem:[%s2735_s30 + $0x58] sm:$0xf] }
  0x2d   : > { %664 = vrot.lane.b32.xlu1 %v2813_v57, %s2646_s4  ;;  %v2838_v23 = vsel %vm2771_vm2, %v330_v13, %v334_v62  ;;  %v339_v28 = vor.u32 %v338_v14, %v334_v62  ;;  %4394 = vst [vmem:[#allocation10_spill] sm:$0xff] %v2855_v34  ;;  %v404_v35 = vshll.u32 %v2834_v19, 16  ;;  %v344_v40 = vrot.slane %v342_v15, 5  ;;  %v2890_v14 = vld [vmem:[%s2735_s30 + $0x44] sm:$0x1] }
  0x2e   : > { %660 = vrot.lane.b32.xlu0 %v297_v58, %s2646_s4  ;;  %4393 = vst [vmem:[#allocation9_spill] sm:$0xff] %v2838_v23  ;;  %666 = vrot.lane.b32.xlu2 %v2838_v23, %s2646_s4  ;;  %v401_v41 = vor.u32 %v400_v21, %v397_v20  ;;  %v390_v43 = vshll.u32 %v2841_v24, 16  ;;  %v371_v44 = vshrl.u32 %v2844_v29, 16  ;;  %v374_v45 = vshll.u32 %v2844_v29, 16 }
  0x2f   : > { %v340_v36 = vrot.slane %v339_v28, 4  ;;  %v2864_v47 = vsel %vm2771_vm2, %v354_v18, %v2786_v39  ;;  %v387_v48 = vor.u32 %v386_v26, %v382_v25  ;;  %v419_v49 = vshrl.u32 %v2851_v33, 16  ;;  %v2875_v39 = vld [vmem:[%s2735_s30 + $0x50] sm:$0x1]  ;;  %v2899_v26 = vld [vmem:[%s2735_s30 + $0x54] sm:$0xf] }
  0x30   : > { %4395 = vst [vmem:[#allocation11_spill] sm:$0xff] %v2864_v47  ;;  %v422_v50 = vshll.u32 %v2851_v33, 16  ;;  %v430_v51 = vrot.slane %v428_v30, 5  ;;  %v434_v52 = vrot.slane %v432_v32, 4  ;;  %v373_v54 = vrot.slane %v371_v44, 4 }
  0x31   : > { %v376_v55 = vrot.slane %v374_v45, 5  ;;  %v2872_v58 = vsel %vm2771_vm2, %v340_v36, %v344_v40  ;;  %4397 = vst [vmem:[#allocation13_spill] sm:$0xff] %v2875_v39  ;;  %v402_v59 = vrot.slane %v401_v41, 4  ;;  %v406_v60 = vrot.slane %v404_v35, 5 }
  0x32   : > { %4396 = vst [vmem:[#allocation12_spill] sm:$0xff] %v2872_v58  ;;  %v388_v62 = vrot.slane %v387_v48, 4  ;;  %v392_v63 = vrot.slane %v390_v43, 5  ;;  %v421_v3 = vrot.slane %v419_v49, 4  ;;  %v424_v5 = vrot.slane %v422_v50, 5 }
  0x33   : > { %v377_v61 = vor.u32 %v376_v55, %v373_v54  ;;  %v435_v8 = vor.u32 %v434_v52, %v430_v51  ;;  %v438_v9 = vshll.u32 %v2875_v39, 16  ;;  %v408_v12 = vshrl.u32 %v2834_v19, 16  ;;  %v2914_v43 = vld [vmem:[%s2735_s30 + $0x64] sm:$0xf]  ;;  %v2921_v52 = vld [vmem:[%s2735_s30 + $0x5c] sm:$0x1] }
  0x34   : > { %v2894_v15 = vsel %vm2771_vm2, %v402_v59, %v406_v60  ;;  %v467_v18 = vshrl.u32 %v2880_v7, 16  ;;  %v470_v20 = vshll.u32 %v2880_v7, 16  ;;  %v2903_v28 = vsel %vm2771_vm2, %v388_v62, %v392_v63  ;;  %4401 = vst [vmem:[#allocation17_spill] sm:$0xff] %v2921_v52  ;;  %v2935_v63 = vld [vmem:[%s2735_s30 + $0x6c] sm:$0xf] }
  0x35   : > { %672 = vrot.lane.b32.xlu1 %v2855_v34, %s2646_s4  ;;  %v378_v13 = vrot.slane %v377_v61, 4  ;;  %4398 = vst [vmem:[#allocation14_spill] sm:$0xff] %v2894_v15  ;;  %v410_v21 = vrot.slane %v408_v12, 4  ;;  %v425_v30 = vor.u32 %v424_v5, %v421_v3  ;;  %v452_v32 = vshll.u32 %v2886_v11, 16  ;;  %v2925_v61 = vld [vmem:[%s2735_s30 + $0x70] sm:$0xf] }
  0x36   : > { %670 = vrot.lane.b32.xlu0 %v2864_v47, %s2646_s4  ;;  %668 = vrot.lane.b32.xlu2 %v2872_v58, %s2646_s4  ;;  %4399 = vst [vmem:[#allocation15_spill] sm:$0xff] %v2903_v28  ;;  %v456_v35 = vshrl.u32 %v2886_v11, 16  ;;  %v436_v36 = vrot.slane %v435_v8, 4  ;;  %v440_v40 = vrot.slane %v438_v9, 5  ;;  %v414_v45 = vshll.u32 %v2890_v14, 16 }
  0x37   : > { %v2911_v41 = vsel %vm2771_vm2, %v378_v13, %v382_v25  ;;  %v411_v44 = vor.u32 %v410_v21, %v406_v60  ;;  %v443_v48 = vshrl.u32 %v2899_v26, 16  ;;  %v469_v49 = vrot.slane %v467_v18, 4  ;;  %4402 = vst [vmem:[#allocation18_spill] sm:$0xff] %v2925_v61  ;;  %v3000_v34 = vld [vmem:[%s2735_s30 + $0x88] sm:$0xf] }
  0x38   : > { %4400 = vst [vmem:[#allocation16_spill] sm:$0xff] %v2911_v41  ;;  %v472_v50 = vrot.slane %v470_v20, 5  ;;  %v446_v54 = vshll.u32 %v2899_v26, 16  ;;  %v426_v55 = vrot.slane %v425_v30, 4  ;;  %v454_v25 = vrot.slane %v452_v32, 5 }
  0x39   : > { %v458_v59 = vrot.slane %v456_v35, 4  ;;  %v2929_v60 = vsel %vm2771_vm2, %v436_v36, %v440_v40  ;;  %v476_v62 = vshll.u32 %v2914_v43, 16  ;;  %v412_v3 = vrot.slane %v411_v44, 4  ;;  %4413 = vst [vmem:[#allocation29_spill] sm:$0xff] %v3000_v34  ;;  %v3010_v58 = vld [vmem:[%s2735_s30 + $0x90] sm:$0xf] }
  0x3a   : > { %4403 = vst [vmem:[#allocation19_spill] sm:$0xff] %v2929_v60  ;;  %v416_v5 = vrot.slane %v414_v45, 5  ;;  %v445_v8 = vrot.slane %v443_v48, 4  ;;  %v448_v9 = vrot.slane %v446_v54, 5  ;;  %v473_v12 = vor.u32 %v472_v50, %v469_v49  ;;  %v2956_v48 = vld [vmem:[%s2735_s30 + $0x74] sm:$0x1] }
  0x3b   : > { %v462_v13 = vshll.u32 %v2921_v52, 16  ;;  %v500_v18 = vshll.u32 %v2925_v61, 16  ;;  %v504_v20 = vshrl.u32 %v2925_v61, 16  ;;  %v2942_v21 = vsel %vm2771_vm2, %v426_v55, %v430_v51  ;;  %4406 = vst [vmem:[#allocation22_spill] sm:$0xff] %v2956_v48  ;;  %v3112_v39 = vld [vmem:[%s2735_s30 + $0xbc] sm:$0x1] }
  0x3c   : > { %4404 = vst [vmem:[#allocation20_spill] sm:$0xff] %v2942_v21  ;;  %v459_v30 = vor.u32 %v458_v59, %v454_v25  ;;  %v491_v32 = vshrl.u32 %v2935_v63, 16  ;;  %v494_v35 = vshll.u32 %v2935_v63, 16  ;;  %v2950_v36 = vsel %vm2771_vm2, %v412_v3, %v416_v5  ;;  %v2959_v3 = vld [vmem:[%s2735_s30 + $0x84] sm:$0xf] }
  0x3d   : > { %678 = vrot.lane.b32.xlu1 %v2894_v15, %s2646_s4  ;;  %4405 = vst [vmem:[#allocation21_spill] sm:$0xff] %v2950_v36  ;;  %v449_v40 = vor.u32 %v448_v9, %v445_v8  ;;  %v480_v44 = vshrl.u32 %v2914_v43, 16  ;;  %v474_v51 = vrot.slane %v473_v12, 4  ;;  %v478_v45 = vrot.slane %v476_v62, 5  ;;  %v2964_v5 = vld [vmem:[%s2735_s30 + $0x7c] sm:$0xf] }
  0x3e   : > { %676 = vrot.lane.b32.xlu0 %v2903_v28, %s2646_s4  ;;  %674 = vrot.lane.b32.xlu2 %v2911_v41, %s2646_s4  ;;  %v502_v49 = vrot.slane %v500_v18, 5  ;;  %v506_v50 = vrot.slane %v504_v20, 4  ;;  %v460_v54 = vrot.slane %v459_v30, 4  ;;  %v464_v55 = vrot.slane %v462_v13, 5  ;;  %4407 = vst [vmem:[#allocation23_spill] sm:$0xff] %v2959_v3 }
  0x3f   : > { %v493_v59 = vrot.slane %v491_v32, 4  ;;  %v510_v8 = vshll.u32 %v2956_v48, 16  ;;  %v450_v9 = vrot.slane %v449_v40, 4  ;;  %v2968_v62 = vld [vmem:[%s2735_s30 + $0x68] sm:$0x1]  ;;  %v482_v12 = vrot.slane %v480_v44, 4 }
  0x40   : > { %4408 = vst [vmem:[#allocation24_spill] sm:$0xff] %v2968_v62  ;;  %v2972_v18 = vsel %vm2771_vm2, %v474_v51, %v478_v45  ;;  %v507_v13 = vor.u32 %v506_v50, %v502_v49  ;;  %v539_v20 = vshrl.u32 %v2959_v3, 16  ;;  %v542_v30 = vshll.u32 %v2959_v3, 16  ;;  %v2977_v32 = vld [vmem:[%s2735_s30 + $0x78] sm:$0xf] }
  0x41   : > { %4409 = vst [vmem:[#allocation25_spill] sm:$0xff] %v2972_v18  ;;  %v524_v15 = vshll.u32 %v2964_v5, 16  ;;  %v528_v44 = vshrl.u32 %v2964_v5, 16  ;;  %v486_v51 = vshll.u32 %v2968_v62, 16  ;;  %v2990_v50 = vsel %vm2771_vm2, %v450_v9, %v454_v25  ;;  %v3003_v25 = vld [vmem:[%s2735_s30 + $0x80] sm:$0x1] }
  0x42   : > { %4411 = vst [vmem:[#allocation27_spill] sm:$0xff] %v2990_v50  ;;  %v544_v41 = vrot.slane %v542_v30, 5 }
  0x43   : > { %4414 = vst [vmem:[#allocation30_spill] sm:$0xff] %v3003_v25  ;;  %v530_v9 = vrot.slane %v528_v44, 4  ;;  %v534_v44 = vshll.u32 %v3003_v25, 16  ;;  %v3078_v25 = vld [vmem:[%s2735_s30 + $0xa4] sm:$0x1] }
  0x44   : > { %4415 = vst [vmem:[#allocation31_spill] sm:$0xff] %v3010_v58 }
  0x45   : > { %684 = vrot.lane.b32.xlu1 %v2929_v60, %s2646_s4  ;;  %v496_v60 = vrot.slane %v494_v35, 5  ;;  %v2981_v35 = vsel %vm2771_vm2, %v460_v54, %v464_v55  ;;  %v518_v54 = vshll.u32 %v2977_v32, 16  ;;  %v508_v55 = vrot.slane %v507_v13, 4  ;;  %4426 = vst [vmem:[#allocation42_spill] sm:$0xff] %v3078_v25 }
  0x46   : > { %682 = vrot.lane.b32.xlu0 %v2942_v21, %s2646_s4  ;;  %680 = vrot.lane.b32.xlu2 %v2950_v36, %s2646_s4  ;;  %4410 = vst [vmem:[#allocation26_spill] sm:$0xff] %v2981_v35  ;;  %v483_v36 = vor.u32 %v482_v12, %v478_v45  ;;  %v2993_v21 = vld [vmem:[%s2735_s30 + $0x94] sm:$0xf]  ;;  %v526_v45 = vrot.slane %v524_v15, 5 }
  0x47   : > { %v497_v40 = vor.u32 %v496_v60, %v493_v59  ;;  %4412 = vst [vmem:[#allocation28_spill] sm:$0xff] %v2993_v21  ;;  %v515_v60 = vshrl.u32 %v2977_v32, 16  ;;  %v512_v59 = vrot.slane %v510_v8, 5  ;;  %v572_v12 = vshll.u32 %v2993_v21, 16 }
  0x48   : > { %v576_v23 = vshrl.u32 %v2993_v21, 16  ;;  %v484_v13 = vrot.slane %v483_v36, 4  ;;  %v488_v8 = vrot.slane %v486_v51, 5  ;;  %v531_v47 = vor.u32 %v530_v9, %v526_v45  ;;  %243 = vst.msk [vmem:[#allocation2 + $0x10] sm:$0xf] %vm238_vm5, %v2780_v37 }
  0x49   : > { %v498_v28 = vrot.slane %v497_v40, 4  ;;  %v3014_v30 = vsel %vm2771_vm2, %v508_v55, %v512_v59  ;;  %v548_v40 = vshll.u32 %v3000_v34, 16  ;;  %v563_v36 = vshrl.u32 %v3010_v58, 16  ;;  %239 = vst.msk [vmem:[#allocation2] sm:$0xf] %vm238_vm5, %v2744_v2 }
  0x4a   : > { %4416 = vst [vmem:[#allocation32_spill] sm:$0xff] %v3014_v30  ;;  %v566_v51 = vshll.u32 %v3010_v58, 16  ;;  %v536_v9 = vrot.slane %v534_v44, 5  ;;  %v614_v44 = vshll.u32 %v3037_v38, 16 }
  0x4b   : > { %v550_v59 = vrot.slane %v548_v40, 5  ;;  %v611_v40 = vshrl.u32 %v3037_v38, 16  ;;  %240 = vst.msk [vmem:[#allocation2 + $0x4] sm:$0xf] %vm238_vm5, %v2750_v6 }
  0x4c   : > { %241 = vst.msk [vmem:[#allocation2 + $0x8] sm:$0xf] %vm238_vm5, %v2738_v0 }
  0x4d   : > { %690 = vrot.lane.b32.xlu1 %v2972_v18, %s2646_s4  ;;  %v541_v18 = vrot.slane %v539_v20, 4  ;;  %v520_v20 = vrot.slane %v518_v54, 5  ;;  %v578_v54 = vrot.slane %v576_v23, 4  ;;  %v532_v23 = vrot.slane %v531_v47, 4  ;;  %242 = vst.msk [vmem:[#allocation2 + $0xc] sm:$0xf] %vm238_vm5, %v2741_v1 }
  0x4e   : > { %688 = vrot.lane.b32.xlu0 %v2981_v35, %s2646_s4  ;;  %686 = vrot.lane.b32.xlu2 %v2990_v50, %s2646_s4  ;;  %v517_v35 = vrot.slane %v515_v60, 4  ;;  %v3020_v50 = vsel %vm2771_vm2, %v498_v28, %v502_v49  ;;  %v574_v60 = vrot.slane %v572_v12, 5  ;;  %v552_v49 = vshrl.u32 %v3000_v34, 16  ;;  %244 = vst.msk [vmem:[#allocation2 + $0x14] sm:$0xf] %vm238_vm5, %v2791_v42 }
  0x4f   : > { %v545_v15 = vor.u32 %v544_v41, %v541_v18  ;;  %4417 = vst [vmem:[#allocation33_spill] sm:$0xff] %v3020_v50  ;;  %v3028_v41 = vsel %vm2771_vm2, %v484_v13, %v488_v8  ;;  %v3031_v18 = vld [vmem:[%s2735_s30 + $0x98] sm:$0x1]  ;;  %v565_v12 = vrot.slane %v563_v36, 4  ;;  %v3043_v8 = vld [vmem:[%s2735_s30 + $0xa0] sm:$0xf] }
  0x50   : > { %4418 = vst [vmem:[#allocation34_spill] sm:$0xff] %v3028_v41  ;;  %v521_v28 = vor.u32 %v520_v20, %v517_v35  ;;  %v579_v13 = vor.u32 %v578_v54, %v574_v60  ;;  %v582_v35 = vshll.u32 %v3031_v18, 16  ;;  %v3055_v36 = vld [vmem:[%s2735_s30 + $0x9c] sm:$0xf] }
  0x51   : > { %4419 = vst [vmem:[#allocation35_spill] sm:$0xff] %v3031_v18  ;;  %v546_v55 = vrot.slane %v545_v15, 4  ;;  %v554_v15 = vrot.slane %v552_v49, 4  ;;  %v600_v49 = vshrl.u32 %v3043_v8, 16 }
  0x52   : > { %4420 = vst [vmem:[#allocation36_spill] sm:$0xff] %v3043_v8  ;;  %v522_v20 = vrot.slane %v521_v28, 4  ;;  %v596_v28 = vshll.u32 %v3043_v8, 16 }
  0x53   : > { %v3050_v47 = vsel %vm2771_vm2, %v546_v55, %v550_v59  ;;  %4423 = vst [vmem:[#allocation39_spill] sm:$0xff] %v3055_v36  ;;  %v584_v55 = vrot.slane %v582_v35, 5  ;;  %v616_v35 = vrot.slane %v614_v44, 5  ;;  %v602_v48 = vrot.slane %v600_v49, 4 }
  0x54   : > { %4422 = vst [vmem:[#allocation38_spill] sm:$0xff] %v3050_v47  ;;  %v3068_v18 = vsel %vm2771_vm2, %v522_v20, %v526_v45  ;;  %v3081_v45 = vld [vmem:[%s2735_s30 + $0xb8] sm:$0xf] }
  0x55   : > { %696 = vrot.lane.b32.xlu1 %v3014_v30, %s2646_s4  ;;  %v568_v30 = vrot.slane %v566_v51, 5  ;;  %v3059_v51 = vsel %vm2771_vm2, %v532_v23, %v536_v9  ;;  %4425 = vst [vmem:[#allocation41_spill] sm:$0xff] %v3068_v18  ;;  %v3071_v23 = vld [vmem:[%s2735_s30 + $0xac] sm:$0xf]  ;;  %v587_v9 = vshrl.u32 %v3055_v36, 16  ;;  %v644_v49 = vshll.u32 %v3081_v45, 16 }
  0x56   : > { %694 = vrot.lane.b32.xlu0 %v3020_v50, %s2646_s4  ;;  %692 = vrot.lane.b32.xlu2 %v3028_v41, %s2646_s4  ;;  %v3046_v50 = vld [vmem:[%s2735_s30 + $0x8c] sm:$0x1]  ;;  %4424 = vst [vmem:[#allocation40_spill] sm:$0xff] %v3059_v51  ;;  %v580_v41 = vrot.slane %v579_v13, 4  ;;  %v613_v13 = vrot.slane %v611_v40, 4  ;;  %v648_v62 = vshrl.u32 %v3081_v45, 16 }
  0x57   : > { %4421 = vst [vmem:[#allocation37_spill] sm:$0xff] %v3046_v50  ;;  %v569_v54 = vor.u32 %v568_v30, %v565_v12  ;;  %v558_v57 = vshll.u32 %v3046_v50, 16  ;;  %v555_v30 = vor.u32 %v554_v15, %v550_v59  ;;  %v590_v12 = vshll.u32 %v3055_v36, 16  ;;  %v3091_v15 = vld [vmem:[%s2735_s30 + $0xb4] sm:$0xf] }
  0x58   : > { %v598_v50 = vrot.slane %v596_v28, 5  ;;  %4427 = vst [vmem:[#allocation43_spill] sm:$0xff] %v3081_v45  ;;  %v3085_v20 = vsel %vm2771_vm2, %v580_v41, %v584_v55  ;;  %v620_v59 = vshll.u32 %v3071_v23, 16  ;;  %v606_v28 = vshll.u32 %v3078_v25, 16 }
  0x59   : > { %4428 = vst [vmem:[#allocation44_spill] sm:$0xff] %v3085_v20  ;;  %v556_v40 = vrot.slane %v555_v30, 4  ;;  %v560_v44 = vrot.slane %v558_v57, 5  ;;  %v592_v52 = vrot.slane %v590_v12, 5  ;;  %v638_v30 = vshll.u32 %v3091_v15, 16 }
  0x5a   : > { %4429 = vst [vmem:[#allocation45_spill] sm:$0xff] %v3091_v15  ;;  %v603_v55 = vor.u32 %v602_v48, %v598_v50  ;;  %v624_v12 = vshrl.u32 %v3071_v23, 16  ;;  %v622_v48 = vrot.slane %v620_v59, 5  ;;  %v608_v25 = vrot.slane %v606_v28, 5 }
  0x5b   : > { %v3106_v57 = vsel %vm2771_vm2, %v556_v40, %v560_v44  ;;  %v640_v45 = vrot.slane %v638_v30, 5  ;;  %v654_v59 = vshll.u32 %v3112_v39, 16  ;;  %245 = vst.msk [vmem:[#allocation2 + $0x18] sm:$0xf] %vm238_vm5, %v2777_v31 }
  0x5c   : > { %4431 = vst [vmem:[#allocation47_spill] sm:$0xff] %v3106_v57 }
  0x5d   : > { %702 = vrot.lane.b32.xlu1 %v3050_v47, %s2646_s4  ;;  %v570_v47 = vrot.slane %v569_v54, 4  ;;  %v617_v54 = vor.u32 %v616_v35, %v613_v13  ;;  %v650_v13 = vrot.slane %v648_v62, 4  ;;  %v604_v35 = vrot.slane %v603_v55, 4  ;;  %246 = vst.msk [vmem:[#allocation2 + $0x1c] sm:$0xf] %vm238_vm5, %v2765_v22 }
  0x5e   : > { %700 = vrot.lane.b32.xlu0 %v3059_v51, %s2646_s4  ;;  %698 = vrot.lane.b32.xlu2 %v3068_v18, %s2646_s4  ;;  %v589_v51 = vrot.slane %v587_v9, 4  ;;  %v635_v18 = vshrl.u32 %v3091_v15, 16  ;;  %247 = vst.msk [vmem:[#allocation2 + $0x20] sm:$0xf] %vm238_vm5, %v2844_v29 }
  0x5f   : > { %v3098_v41 = vsel %vm2771_vm2, %v570_v47, %v574_v60  ;;  %v618_v60 = vrot.slane %v617_v54, 4  ;;  %v646_v47 = vrot.slane %v644_v49, 5  ;;  %v3122_v54 = vld [vmem:[%s2735_s30 + $0xb0] sm:$0x1]  ;;  %v3126_v62 = vsel %vm2771_vm2, %v604_v35, %v608_v25  ;;  %248 = vst.msk [vmem:[#allocation2 + $0x24] sm:$0xf] %vm238_vm5, %v2809_v56 }
  0x60   : > { %4430 = vst [vmem:[#allocation46_spill] sm:$0xff] %v3098_v41  ;;  %v593_v9 = vor.u32 %v592_v52, %v589_v51  ;;  %v626_v51 = vrot.slane %v624_v12, 4  ;;  %v630_v55 = vshll.u32 %v3122_v54, 16  ;;  %v847_v35 = vrot.slane %v2741_v1, 5 }
  0x61   : > { %v3118_v40 = vsel %vm2771_vm2, %v618_v60, %v622_v48  ;;  %v651_v44 = vor.u32 %v650_v13, %v646_v47  ;;  %4432 = vst [vmem:[#allocation48_spill] sm:$0xff] %v3126_v62  ;;  %v840_v60 = vrot.slane %v2750_v6, 5  ;;  %v2362_v13 = vrot.slane %v2738_v0, 9 }
  0x62   : > { %v594_v52 = vrot.slane %v593_v9, 4  ;;  %v627_v49 = vor.u32 %v626_v51, %v622_v48  ;;  %v656_v9 = vrot.slane %v654_v59, 5  ;;  %v843_v51 = vrot.slane %v2761_v17, 5  ;;  %249 = vst.msk [vmem:[#allocation2 + $0x28] sm:$0xf] %vm238_vm5, %v2805_v53 }
  0x63   : > { %v652_v30 = vrot.slane %v651_v44, 4  ;;  %v2361_v44 = vrot.slane %v2744_v2, 9  ;;  %v3174_v59 = vsel %vm3158_vm6, %v2362_v13, %v847_v35  ;;  %v854_v17 = vrot.slane %v2791_v42, 5  ;;  %250 = vst.msk [vmem:[#allocation2 + $0x2c] sm:$0xf] %vm238_vm5, %v2834_v19 }
  0x64   : > { %v3132_v28 = vsel %vm2771_vm2, %v594_v52, %v598_v50  ;;  %v628_v25 = vrot.slane %v627_v49, 4  ;;  %v842_v52 = vrot.slane %v840_v60, 4  ;;  %v857_v49 = vrot.slane %v2821_v4, 5  ;;  %251 = vst.msk [vmem:[#allocation2 + $0x30] sm:$0xf] %vm238_vm5, %v2851_v33 }
  0x65   : > { %708 = vrot.lane.b32.xlu1 %v3085_v20, %s2646_s4  ;;  %v637_v20 = vrot.slane %v635_v18, 4  ;;  %4433 = vst [vmem:[#allocation49_spill] sm:$0xff] %v3132_v28  ;;  %v841_v2 = vsel %vm3158_vm6, %v2361_v44, %v840_v60  ;;  %v856_v6 = vrot.slane %v854_v17, 4  ;;  %v868_v60 = vrot.slane %v2809_v56, 5 }
  0x66   : > { %706 = vrot.lane.b32.xlu0 %v3098_v41, %s2646_s4  ;;  %704 = vrot.lane.b32.xlu2 %v3106_v57, %s2646_s4  ;;  %252 = vst.msk [vmem:[#allocation2 + $0x34] sm:$0xf] %vm238_vm5, %v2830_v16 }
  0x67   : > { %v641_v18 = vor.u32 %v640_v45, %v637_v20  ;;  %v632_v45 = vrot.slane %v630_v55, 5  ;;  %v3141_v20 = vsel %vm2771_vm2, %v652_v30, %v656_v9  ;;  %v2363_v55 = vrot.slane %v2780_v37, 9  ;;  %253 = vst.msk [vmem:[#allocation2 + $0x38] sm:$0xf] %vm238_vm5, %v2899_v26 }
  0x68   : > { %v849_v30 = vrot.slane %v847_v35, 4  ;;  %v850_v9 = vrot.slane %v2756_v10, 5  ;;  %v3206_v4 = vsel %vm3158_vm6, %v856_v6, %v857_v49  ;;  %254 = vst.msk [vmem:[#allocation2 + $0x3c] sm:$0xf] %vm238_vm5, %v2886_v11  ;;  %v864_v35 = vrot.slane %v2798_v46, 5 }
  0x69   : > { %v642_v12 = vrot.slane %v641_v18, 4  ;;  %v3152_v48 = vsel %vm2771_vm2, %v628_v25, %v632_v45  ;;  %v844_v18 = vsel %vm3158_vm6, %v842_v52, %v843_v51  ;;  %v861_v25 = vrot.slane %v2765_v22, 5  ;;  %255 = vst.msk [vmem:[#allocation2 + $0x40] sm:$0xf] %vm238_vm5, %v2880_v7 }
  0x6a   : > { %v3223_v10 = vsel %vm3158_vm6, %v849_v30, %v850_v9  ;;  %v2365_v45 = vrot.slane %v2844_v29, 9  ;;  %256 = vst.msk [vmem:[#allocation2 + $0x44] sm:$0xf] %vm238_vm5, %v2914_v43  ;;  %v2364_v52 = vrot.slane %v2777_v31, 9  ;;  %v875_v46 = vrot.slane %v2834_v19, 5 }
  0x6b   : > { %v3145_v50 = vsel %vm2771_vm2, %v642_v12, %v646_v47  ;;  %v3212_v12 = vsel %vm3158_vm6, %v2363_v55, %v854_v17  ;;  %v863_v13 = vrot.slane %v861_v25, 4  ;;  %257 = vst.msk [vmem:[#allocation2 + $0x48] sm:$0xf] %vm238_vm5, %v2935_v63  ;;  %v878_v6 = vrot.slane %v2890_v14, 5 }
  0x6c   : > { %v3245_v51 = vsel %vm3158_vm6, %v2365_v45, %v868_v60  ;;  %258 = vst.msk [vmem:[#allocation2 + $0x4c] sm:$0xf] %vm238_vm5, %v2925_v61  ;;  %v2366_v49 = vrot.slane %v2805_v53, 9  ;;  %v870_v55 = vrot.slane %v868_v60, 4  ;;  %v871_v14 = vrot.slane %v2841_v24, 5 }
  0x6d   : > { %714 = vrot.lane.b32.xlu1 %v3118_v40, %s2646_s4  ;;  %4436 = vst [vmem:[#allocation50_spill] sm:$0xff] %v3245_v51  ;;  %v3252_v17 = vsel %vm3158_vm6, %v863_v13, %v864_v35  ;;  %v882_v45 = vrot.slane %v2830_v16, 5  ;;  %v2368_v60 = vrot.slane %v2899_v26, 9  ;;  %v889_v13 = vrot.slane %v2886_v11, 5  ;;  %v4440_v35 = vld [vmem:[#allocation43_spill] sm:$0xff] }
  0x6e   : > { %712 = vrot.lane.b32.xlu0 %v3126_v62, %s2646_s4  ;;  %710 = vrot.lane.b32.xlu2 %v3132_v28, %s2646_s4  ;;  %259 = vst.msk [vmem:[#allocation2 + $0x50] sm:$0xf] %vm238_vm5, %v2977_v32  ;;  %v3301_v24 = vsel %vm3158_vm6, %v870_v55, %v871_v14  ;;  %v896_v14 = vrot.slane %v2914_v43, 5 }
  0x6f   : > { %260 = vst.msk [vmem:[#allocation2 + $0x54] sm:$0xf] %vm238_vm5, %v2964_v5  ;;  %v3319_v55 = vsel %vm3158_vm6, %v2368_v60, %v889_v13  ;;  %v4445_v60 = vld [vmem:[#allocation24_spill] sm:$0xff] }
  0x70   : > { %261 = vst.msk [vmem:[#allocation2 + $0x58] sm:$0xf] %vm238_vm5, %v2959_v3 }
  0x71   : > { %262 = vst.msk [vmem:[#allocation2 + $0x5c] sm:$0xf] %vm238_vm5, %v3000_v34 }
  0x72   : > { %263 = vst.msk [vmem:[#allocation2 + $0x60] sm:$0xf] %vm238_vm5, %v3010_v58 }
  0x73   : > { %264 = vst.msk [vmem:[#allocation2 + $0x64] sm:$0xf] %vm238_vm5, %v2993_v21 }
  0x74   : > { %265 = vst.msk [vmem:[#allocation2 + $0x68] sm:$0xf] %vm238_vm5, %v3055_v36 }
  0x75   : > { %720 = vrot.lane.b32.xlu1 %v3141_v20, %s2646_s4  ;;  %266 = vst.msk [vmem:[#allocation2 + $0x6c] sm:$0xf] %vm238_vm5, %v3043_v8 }
  0x76   : > { %718 = vrot.lane.b32.xlu0 %v3145_v50, %s2646_s4  ;;  %716 = vrot.lane.b32.xlu2 %v3152_v48, %s2646_s4  ;;  %267 = vst.msk [vmem:[#allocation2 + $0x70] sm:$0xf] %vm238_vm5, %v3037_v38  ;;  %s2359_s4 = sshll.u32 %s175_s28, 8 }
  0x77   : > { %268 = vst.msk [vmem:[#allocation2 + $0x74] sm:$0xf] %vm238_vm5, %v3071_v23 }
  0x78   : > { %4439 = vst [vmem:[#allocation53_spill] sm:$0xff] %v3301_v24 }
  0x79   : > { %269 = vst.msk [vmem:[#allocation2 + $0x78] sm:$0xf] %vm238_vm5, %v3091_v15 }
  0x7a   : > { %270 = vst.msk [vmem:[#allocation2 + $0x7c] sm:$0xf] %vm238_vm5, %v4440_v35 }
  0x7d   : > { %954 = vrot.lane.b32.xlu1 %v3174_v59, %s2647_s5 }
  0x7e   : > { %952 = vrot.lane.b32.xlu0 %v844_v18, %s2647_s5  ;;  %950 = vrot.lane.b32.xlu2 %v841_v2, %s2647_s5  ;;  %v3263_v18 = vsel %vm3158_vm6, %v2364_v52, %v861_v25  ;;  %v877_v2 = vrot.slane %v875_v46, 4  ;;  %v3288_v25 = vsel %vm3158_vm6, %v2366_v49, %v875_v46  ;;  %v884_v46 = vrot.slane %v882_v45, 4 }
  0x7f   : > { %4438 = vst [vmem:[#allocation52_spill] sm:$0xff] %v3288_v25  ;;  %v2367_v49 = vrot.slane %v2851_v33, 9 }
  0x80   : > { %v3282_v30 = vsel %vm3158_vm6, %v877_v2, %v878_v6 }
  0x81   : > { %4437 = vst [vmem:[#allocation51_spill] sm:$0xff] %v3282_v30 }
  0x85   : > { %960 = vrot.lane.b32.xlu1 %v3206_v4, %s2647_s5 }
  0x86   : > { %958 = vrot.lane.b32.xlu0 %v3212_v12, %s2647_s5  ;;  %956 = vrot.lane.b32.xlu2 %v3223_v10, %s2647_s5 }
  0x88   : > { %v667_v44 = vpop.permute.xlu2 %666 }
  0x89   : > { %759 = vst.msk [vmem:[#allocation2 + $0x10] sm:$0xf] %vm754_vm7, %v667_v44  ;;  %v4441_v44 = vld [vmem:[#allocation13_spill] sm:$0xff] }
  0x8a   : > { %v885_v2 = vrot.slane %v4441_v44, 5  ;;  %4442 = vst [vmem:[#allocation13_spill] sm:$0xff] %v3319_v55  ;;  %v3332_v44 = vsel %vm3158_vm6, %v2367_v49, %v882_v45  ;;  %v4446_v45 = vld [vmem:[#allocation17_spill] sm:$0xff] }
  0x8b   : > { %4444 = vst [vmem:[#allocation55_spill] sm:$0xff] %v3332_v44 }
  0x8d   : > { %966 = vrot.lane.b32.xlu1 %v3245_v51, %s2647_s5 }
  0x8e   : > { %964 = vrot.lane.b32.xlu0 %v3252_v17, %s2647_s5  ;;  %962 = vrot.lane.b32.xlu2 %v3263_v18, %s2647_s5 }
  0x90   : > { %v669_v9 = vpop.permute.xlu2 %668 }
  0x91   : > { %760 = vst.msk [vmem:[#allocation2 + $0x14] sm:$0xf] %vm754_vm7, %v669_v9  ;;  %v898_v9 = vrot.slane %v896_v14, 4 }
  0x95   : > { %972 = vrot.lane.b32.xlu1 %v3282_v30, %s2647_s5 }
  0x96   : > { %970 = vrot.lane.b32.xlu0 %v3288_v25, %s2647_s5  ;;  %968 = vrot.lane.b32.xlu2 %v3301_v24, %s2647_s5  ;;  %v2369_v24 = vrot.slane %v2880_v7, 9 }
  0x97   : > { %v663_v52 = vpop.permute.xlu1 %662 }
  0x98   : > { %757 = vst.msk [vmem:[#allocation2 + $0x8] sm:$0xf] %vm754_vm7, %v663_v52  ;;  %v659_v6 = vpop.permute.xlu0 %658  ;;  %v675_v30 = vpop.permute.xlu2 %674  ;;  %v3325_v52 = vsel %vm3158_vm6, %v884_v46, %v885_v2  ;;  %v892_v2 = vrot.slane %v4446_v45, 5 }
  0x99   : > { %755 = vst.msk [vmem:[#allocation2] sm:$0xf] %vm754_vm7, %v659_v6  ;;  %v899_v6 = vrot.slane %v4445_v60, 5  ;;  %v3349_v60 = vsel %vm3158_vm6, %v2369_v24, %v896_v14 }
  0x9a   : > { %4443 = vst [vmem:[#allocation54_spill] sm:$0xff] %v3325_v52 }
  0x9b   : > { %763 = vst.msk [vmem:[#allocation2 + $0x20] sm:$0xf] %vm754_vm7, %v675_v30  ;;  %v891_v30 = vrot.slane %v889_v13, 4  ;;  %v3345_v49 = vsel %vm3158_vm6, %v898_v9, %v899_v6  ;;  %v2371_v9 = vrot.slane %v2977_v32, 9  ;;  %v910_v6 = vrot.slane %v2964_v5, 5 }
  0x9c   : > { %4447 = vst [vmem:[#allocation24_spill] sm:$0xff] %v3345_v49 }
  0x9d   : > { %978 = vrot.lane.b32.xlu1 %v3319_v55, %s2647_s5  ;;  %4448 = vst [vmem:[#allocation17_spill] sm:$0xff] %v3349_v60  ;;  %v3357_v13 = vsel %vm3158_vm6, %v891_v30, %v892_v2  ;;  %v2370_v30 = vrot.slane %v2935_v63, 9  ;;  %v3371_v2 = vsel %vm3158_vm6, %v2371_v9, %v910_v6 }
  0x9e   : > { %976 = vrot.lane.b32.xlu0 %v3325_v52, %s2647_s5  ;;  %974 = vrot.lane.b32.xlu2 %v3332_v44, %s2647_s5  ;;  %4449 = vst [vmem:[#allocation56_spill] sm:$0xff] %v3357_v13  ;;  %v2372_v52 = vrot.slane %v2959_v3, 9 }
  0x9f   : > { %v665_v51 = vpop.permute.xlu1 %664 }
  0xa0   : > { %758 = vst.msk [vmem:[#allocation2 + $0xc] sm:$0xf] %vm754_vm7, %v665_v51  ;;  %v661_v46 = vpop.permute.xlu0 %660  ;;  %v681_v55 = vpop.permute.xlu2 %680  ;;  %v903_v51 = vrot.slane %v2925_v61, 5 }
  0xa1   : > { %756 = vst.msk [vmem:[#allocation2 + $0x4] sm:$0xf] %vm754_vm7, %v661_v46  ;;  %v4450_v46 = vld [vmem:[#allocation22_spill] sm:$0xff] }
  0xa2   : > { %766 = vst.msk [vmem:[#allocation2 + $0x2c] sm:$0xf] %vm754_vm7, %v681_v55  ;;  %v905_v14 = vrot.slane %v903_v51, 4  ;;  %v906_v45 = vrot.slane %v4450_v46, 5 }
  0xa3   : > { %4451 = vst [vmem:[#allocation22_spill] sm:$0xff] %v3371_v2 }
  0xa4   : > { %v3376_v46 = vsel %vm3158_vm6, %v905_v14, %v906_v45 }
  0xa5   : > { %984 = vrot.lane.b32.xlu1 %v3345_v49, %s2647_s5  ;;  %v917_v49 = vrot.slane %v3000_v34, 5  ;;  %4452 = vst [vmem:[#allocation57_spill] sm:$0xff] %v3376_v46 }
  0xa6   : > { %982 = vrot.lane.b32.xlu0 %v3349_v60, %s2647_s5  ;;  %980 = vrot.lane.b32.xlu2 %v3357_v13, %s2647_s5 }
  0xa7   : > { %v673_v24 = vpop.permute.xlu1 %672  ;;  %v919_v9 = vrot.slane %v917_v49, 4 }
  0xa8   : > { %762 = vst.msk [vmem:[#allocation2 + $0x1c] sm:$0xf] %vm754_vm7, %v673_v24  ;;  %v671_v55 = vpop.permute.xlu0 %670  ;;  %v687_v60 = vpop.permute.xlu2 %686  ;;  %v3383_v24 = vsel %vm3158_vm6, %v2370_v30, %v903_v51  ;;  %v4455_v51 = vld [vmem:[#allocation30_spill] sm:$0xff] }
  0xa9   : > { %761 = vst.msk [vmem:[#allocation2 + $0x18] sm:$0xf] %vm754_vm7, %v671_v55  ;;  %v4454_v55 = vld [vmem:[#allocation37_spill] sm:$0xff]  ;;  %v913_v45 = vrot.slane %v4455_v51, 5 }
  0xaa   : > { %769 = vst.msk [vmem:[#allocation2 + $0x38] sm:$0xf] %vm754_vm7, %v687_v60  ;;  %v920_v13 = vrot.slane %v4454_v55, 5  ;;  %v912_v60 = vrot.slane %v910_v6, 4  ;;  %v3400_v55 = vsel %vm3158_vm6, %v2372_v52, %v917_v49 }
  0xab   : > { %4453 = vst [vmem:[#allocation58_spill] sm:$0xff] %v3383_v24 }
  0xac   : > { %v3396_v30 = vsel %vm3158_vm6, %v919_v9, %v920_v13  ;;  %4457 = vst [vmem:[#allocation30_spill] sm:$0xff] %v3400_v55  ;;  %v3408_v6 = vsel %vm3158_vm6, %v912_v60, %v913_v45  ;;  %v2374_v13 = vrot.slane %v3055_v36, 9  ;;  %v931_v9 = vrot.slane %v3043_v8, 5 }
  0xad   : > { %990 = vrot.lane.b32.xlu1 %v3371_v2, %s2647_s5  ;;  %4456 = vst [vmem:[#allocation37_spill] sm:$0xff] %v3396_v30  ;;  %v2373_v60 = vrot.slane %v3010_v58, 9 }
  0xae   : > { %988 = vrot.lane.b32.xlu0 %v3376_v46, %s2647_s5  ;;  %986 = vrot.lane.b32.xlu2 %v3383_v24, %s2647_s5  ;;  %4458 = vst [vmem:[#allocation59_spill] sm:$0xff] %v3408_v6  ;;  %v3422_v45 = vsel %vm3158_vm6, %v2374_v13, %v931_v9  ;;  %v2375_v24 = vrot.slane %v3037_v38, 9 }
  0xaf   : > { %v679_v44 = vpop.permute.xlu1 %678 }
  0xb0   : > { %765 = vst.msk [vmem:[#allocation2 + $0x28] sm:$0xf] %vm754_vm7, %v679_v44  ;;  %v677_v14 = vpop.permute.xlu0 %676  ;;  %v693_v2 = vpop.permute.xlu2 %692  ;;  %v924_v44 = vrot.slane %v2993_v21, 5 }
  0xb1   : > { %764 = vst.msk [vmem:[#allocation2 + $0x24] sm:$0xf] %vm754_vm7, %v677_v14  ;;  %v4459_v14 = vld [vmem:[#allocation35_spill] sm:$0xff] }
  0xb2   : > { %772 = vst.msk [vmem:[#allocation2 + $0x44] sm:$0xf] %vm754_vm7, %v693_v2  ;;  %v926_v49 = vrot.slane %v924_v44, 4  ;;  %v927_v51 = vrot.slane %v4459_v14, 5 }
  0xb3   : > { %4460 = vst [vmem:[#allocation35_spill] sm:$0xff] %v3422_v45 }
  0xb4   : > { %v3427_v14 = vsel %vm3158_vm6, %v926_v49, %v927_v51 }
  0xb5   : > { %996 = vrot.lane.b32.xlu1 %v3396_v30, %s2647_s5  ;;  %v938_v30 = vrot.slane %v3071_v23, 5 }
  0xb6   : > { %994 = vrot.lane.b32.xlu0 %v3400_v55, %s2647_s5  ;;  %992 = vrot.lane.b32.xlu2 %v3408_v6, %s2647_s5 }
  0xb7   : > { %v685_v52 = vpop.permute.xlu1 %684  ;;  %v940_v13 = vrot.slane %v938_v30, 4 }
  0xb8   : > { %768 = vst.msk [vmem:[#allocation2 + $0x34] sm:$0xf] %vm754_vm7, %v685_v52  ;;  %v683_v2 = vpop.permute.xlu0 %682  ;;  %v699_v55 = vpop.permute.xlu2 %698  ;;  %v3434_v52 = vsel %vm3158_vm6, %v2373_v60, %v924_v44  ;;  %v4461_v44 = vld [vmem:[#allocation42_spill] sm:$0xff] }
  0xb9   : > { %767 = vst.msk [vmem:[#allocation2 + $0x30] sm:$0xf] %vm754_vm7, %v683_v2  ;;  %v941_v2 = vrot.slane %v3122_v54, 5  ;;  %v934_v51 = vrot.slane %v4461_v44, 5  ;;  %v3451_v54 = vsel %vm3158_vm6, %v2375_v24, %v938_v30  ;;  %v2376_v30 = vrot.slane %v3091_v15, 9 }
  0xba   : > { %775 = vst.msk [vmem:[#allocation2 + $0x50] sm:$0xf] %vm754_vm7, %v699_v55  ;;  %v933_v55 = vrot.slane %v931_v9, 4 }
  0xbb   : > { %v3447_v60 = vsel %vm3158_vm6, %v940_v13, %v941_v2 }
  0xbc   : > { %v3459_v9 = vsel %vm3158_vm6, %v933_v55, %v934_v51 }
  0xbd   : > { %1002 = vrot.lane.b32.xlu1 %v3422_v45, %s2647_s5  ;;  %4462 = vst [vmem:[#allocation42_spill] sm:$0xff] %v3459_v9 }
  0xbe   : > { %1000 = vrot.lane.b32.xlu0 %v3427_v14, %s2647_s5  ;;  %998 = vrot.lane.b32.xlu2 %v3434_v52, %s2647_s5 }
  0xbf   : > { %v691_v6 = vpop.permute.xlu1 %690 }
  0xc0   : > { %771 = vst.msk [vmem:[#allocation2 + $0x40] sm:$0xf] %vm754_vm7, %v691_v6  ;;  %v689_v49 = vpop.permute.xlu0 %688  ;;  %v705_v45 = vpop.permute.xlu2 %704  ;;  %v945_v6 = vrot.slane %v4440_v35, 5 }
  0xc1   : > { %770 = vst.msk [vmem:[#allocation2 + $0x3c] sm:$0xf] %vm754_vm7, %v689_v49  ;;  %v948_v49 = vrot.slane %v3112_v39, 5 }
  0xc2   : > { %778 = vst.msk [vmem:[#allocation2 + $0x5c] sm:$0xf] %vm754_vm7, %v705_v45  ;;  %v947_v2 = vrot.slane %v945_v6, 4  ;;  %v3478_v39 = vsel %vm3158_vm6, %v2376_v30, %v945_v6 }
  0xc4   : > { %v3471_v55 = vsel %vm3158_vm6, %v947_v2, %v948_v49 }
  0xc5   : > { %1008 = vrot.lane.b32.xlu1 %v3447_v60, %s2647_s5 }
  0xc6   : > { %1006 = vrot.lane.b32.xlu0 %v3451_v54, %s2647_s5  ;;  %1004 = vrot.lane.b32.xlu2 %v3459_v9, %s2647_s5 }
  0xc7   : > { %v697_v13 = vpop.permute.xlu1 %696 }
  0xc8   : > { %774 = vst.msk [vmem:[#allocation2 + $0x4c] sm:$0xf] %vm754_vm7, %v697_v13  ;;  %v695_v24 = vpop.permute.xlu0 %694  ;;  %v711_v45 = vpop.permute.xlu2 %710 }
  0xc9   : > { %773 = vst.msk [vmem:[#allocation2 + $0x48] sm:$0xf] %vm754_vm7, %v695_v24 }
  0xca   : > { %781 = vst.msk [vmem:[#allocation2 + $0x68] sm:$0xf] %vm754_vm7, %v711_v45 }
  0xcd   : > { %1081 = vrot.lane.b32.xlu1 %v2738_v0, %s2648_s6 }
  0xce   : > { %1012 = vrot.lane.b32.xlu0 %v3471_v55, %s2647_s5  ;;  %1010 = vrot.lane.b32.xlu2 %v3478_v39, %s2647_s5 }
  0xcf   : > { %v703_v44 = vpop.permute.xlu1 %702 }
  0xd0   : > { %777 = vst.msk [vmem:[#allocation2 + $0x58] sm:$0xf] %vm754_vm7, %v703_v44  ;;  %v701_v51 = vpop.permute.xlu0 %700  ;;  %v717_v13 = vpop.permute.xlu2 %716 }
  0xd1   : > { %776 = vst.msk [vmem:[#allocation2 + $0x54] sm:$0xf] %vm754_vm7, %v701_v51 }
  0xd2   : > { %784 = vst.msk [vmem:[#allocation2 + $0x74] sm:$0xf] %vm754_vm7, %v717_v13 }
  0xd5   : > { %1087 = vrot.lane.b32.xlu1 %v2791_v42, %s2648_s6 }
  0xd6   : > { %1085 = vrot.lane.b32.xlu0 %v2780_v37, %s2648_s6  ;;  %1083 = vrot.lane.b32.xlu2 %v2741_v1, %s2648_s6 }
  0xd7   : > { %v709_v0 = vpop.permute.xlu1 %708 }
  0xd8   : > { %780 = vst.msk [vmem:[#allocation2 + $0x64] sm:$0xf] %vm754_vm7, %v709_v0  ;;  %v707_v6 = vpop.permute.xlu0 %706  ;;  %v951_v2 = vpop.permute.xlu2 %950 }
  0xd9   : > { %779 = vst.msk [vmem:[#allocation2 + $0x60] sm:$0xf] %vm754_vm7, %v707_v6 }
  0xda   : > { %1047 = vst.msk [vmem:[#allocation2] sm:$0xf] %vm1046_vm8, %v951_v2 }
  0xdd   : > { %1093 = vrot.lane.b32.xlu1 %v2844_v29, %s2648_s6 }
  0xde   : > { %1091 = vrot.lane.b32.xlu0 %v2765_v22, %s2648_s6  ;;  %1089 = vrot.lane.b32.xlu2 %v2777_v31, %s2648_s6 }
  0xdf   : > { %v715_v49 = vpop.permute.xlu1 %714 }
  0xe0   : > { %783 = vst.msk [vmem:[#allocation2 + $0x70] sm:$0xf] %vm754_vm7, %v715_v49  ;;  %v713_v24 = vpop.permute.xlu0 %712  ;;  %v957_v1 = vpop.permute.xlu2 %956 }
  0xe1   : > { %782 = vst.msk [vmem:[#allocation2 + $0x6c] sm:$0xf] %vm754_vm7, %v713_v24 }
  0xe2   : > { %1050 = vst.msk [vmem:[#allocation2 + $0xc] sm:$0xf] %vm1046_vm8, %v957_v1 }
  0xe5   : > { %1099 = vrot.lane.b32.xlu1 %v2834_v19, %s2648_s6 }
  0xe6   : > { %1097 = vrot.lane.b32.xlu0 %v2805_v53, %s2648_s6  ;;  %1095 = vrot.lane.b32.xlu2 %v2809_v56, %s2648_s6 }
  0xe7   : > { %v721_v30 = vpop.permute.xlu1 %720 }
  0xe8   : > { %786 = vst.msk [vmem:[#allocation2 + $0x7c] sm:$0xf] %vm754_vm7, %v721_v30  ;;  %v719_v45 = vpop.permute.xlu0 %718  ;;  %v963_v44 = vpop.permute.xlu2 %962 }
  0xe9   : > { %785 = vst.msk [vmem:[#allocation2 + $0x78] sm:$0xf] %vm754_vm7, %v719_v45 }
  0xea   : > { %1053 = vst.msk [vmem:[#allocation2 + $0x18] sm:$0xf] %vm1046_vm8, %v963_v44 }
  0xed   : > { %1105 = vrot.lane.b32.xlu1 %v2899_v26, %s2648_s6 }
  0xee   : > { %1103 = vrot.lane.b32.xlu0 %v2830_v16, %s2648_s6  ;;  %1101 = vrot.lane.b32.xlu2 %v2851_v33, %s2648_s6 }
  0xef   : > { %v955_v51 = vpop.permute.xlu1 %954 }
  0xf0   : > { %1049 = vst.msk [vmem:[#allocation2 + $0x8] sm:$0xf] %vm1046_vm8, %v955_v51  ;;  %v953_v13 = vpop.permute.xlu0 %952  ;;  %v969_v0 = vpop.permute.xlu2 %968 }
  0xf1   : > { %1048 = vst.msk [vmem:[#allocation2 + $0x4] sm:$0xf] %vm1046_vm8, %v953_v13 }
  0xf2   : > { %1056 = vst.msk [vmem:[#allocation2 + $0x24] sm:$0xf] %vm1046_vm8, %v969_v0 }
  0xf5   : > { %1111 = vrot.lane.b32.xlu1 %v2914_v43, %s2648_s6 }
  0xf6   : > { %1109 = vrot.lane.b32.xlu0 %v2880_v7, %s2648_s6  ;;  %1107 = vrot.lane.b32.xlu2 %v2886_v11, %s2648_s6 }
  0xf7   : > { %v961_v6 = vpop.permute.xlu1 %960 }
  0xf8   : > { %1052 = vst.msk [vmem:[#allocation2 + $0x14] sm:$0xf] %vm1046_vm8, %v961_v6  ;;  %v959_v2 = vpop.permute.xlu0 %958  ;;  %v975_v49 = vpop.permute.xlu2 %974 }
  0xf9   : > { %1051 = vst.msk [vmem:[#allocation2 + $0x10] sm:$0xf] %vm1046_vm8, %v959_v2 }
  0xfa   : > { %1059 = vst.msk [vmem:[#allocation2 + $0x30] sm:$0xf] %vm1046_vm8, %v975_v49 }
  0xfd   : > { %1117 = vrot.lane.b32.xlu1 %v2977_v32, %s2648_s6 }
  0xfe   : > { %1115 = vrot.lane.b32.xlu0 %v2925_v61, %s2648_s6  ;;  %1113 = vrot.lane.b32.xlu2 %v2935_v63, %s2648_s6  ;;  %v4470_v61 = vld [vmem:[#allocation10_spill] sm:$0xff] }
  0xff   : > { %v967_v24 = vpop.permute.xlu1 %966 }
 0x100   : > { %1055 = vst.msk [vmem:[#allocation2 + $0x20] sm:$0xf] %vm1046_vm8, %v967_v24  ;;  %v965_v1 = vpop.permute.xlu0 %964  ;;  %v981_v30 = vpop.permute.xlu2 %980  ;;  %v3568_v24 = vld [vmem:[%s2735_s30 + $0xc0] sm:$0xf] }
 0x101   : > { %1054 = vst.msk [vmem:[#allocation2 + $0x1c] sm:$0xf] %vm1046_vm8, %v965_v1 }
 0x102   : > { %1062 = vst.msk [vmem:[#allocation2 + $0x3c] sm:$0xf] %vm1046_vm8, %v981_v30 }
 0x105   : > { %1123 = vrot.lane.b32.xlu1 %v3000_v34, %s2648_s6 }
 0x106   : > { %1121 = vrot.lane.b32.xlu0 %v2959_v3, %s2648_s6  ;;  %1119 = vrot.lane.b32.xlu2 %v2964_v5, %s2648_s6 }
 0x107   : > { %v973_v45 = vpop.permute.xlu1 %972 }
 0x108   : > { %1058 = vst.msk [vmem:[#allocation2 + $0x2c] sm:$0xf] %vm1046_vm8, %v973_v45  ;;  %v971_v44 = vpop.permute.xlu0 %970  ;;  %v987_v51 = vpop.permute.xlu2 %986 }
 0x109   : > { %1057 = vst.msk [vmem:[#allocation2 + $0x28] sm:$0xf] %vm1046_vm8, %v971_v44 }
 0x10a   : > { %1065 = vst.msk [vmem:[#allocation2 + $0x48] sm:$0xf] %vm1046_vm8, %v987_v51  ;;  %v4463_v51 = vld [vmem:[#allocation8_spill] sm:$0xff] }
 0x10d   : > { %1129 = vrot.lane.b32.xlu1 %v3055_v36, %s2648_s6 }
 0x10e   : > { %1127 = vrot.lane.b32.xlu0 %v2993_v21, %s2648_s6  ;;  %1125 = vrot.lane.b32.xlu2 %v3010_v58, %s2648_s6 }
 0x10f   : > { %v979_v13 = vpop.permute.xlu1 %978 }
 0x110   : > { %1061 = vst.msk [vmem:[#allocation2 + $0x38] sm:$0xf] %vm1046_vm8, %v979_v13  ;;  %v977_v0 = vpop.permute.xlu0 %976  ;;  %v993_v6 = vpop.permute.xlu2 %992  ;;  %v3583_v13 = vld [vmem:[%s2735_s30 + $0xc4] sm:$0xf] }
 0x111   : > { %1060 = vst.msk [vmem:[#allocation2 + $0x34] sm:$0xf] %vm1046_vm8, %v977_v0  ;;  %v4464_v0 = vld [vmem:[#allocation7_spill] sm:$0xff] }
 0x112   : > { %1068 = vst.msk [vmem:[#allocation2 + $0x54] sm:$0xf] %vm1046_vm8, %v993_v6 }
 0x115   : > { %1135 = vrot.lane.b32.xlu1 %v3071_v23, %s2648_s6 }
 0x116   : > { %1133 = vrot.lane.b32.xlu0 %v3037_v38, %s2648_s6  ;;  %1131 = vrot.lane.b32.xlu2 %v3043_v8, %s2648_s6 }
 0x117   : > { %v985_v2 = vpop.permute.xlu1 %984 }
 0x118   : > { %1064 = vst.msk [vmem:[#allocation2 + $0x44] sm:$0xf] %vm1046_vm8, %v985_v2  ;;  %v983_v49 = vpop.permute.xlu0 %982  ;;  %v999_v1 = vpop.permute.xlu2 %998 }
 0x119   : > { %1063 = vst.msk [vmem:[#allocation2 + $0x40] sm:$0xf] %vm1046_vm8, %v983_v49 }
 0x11a   : > { %1071 = vst.msk [vmem:[#allocation2 + $0x60] sm:$0xf] %vm1046_vm8, %v999_v1  ;;  %v4465_v1 = vld [vmem:[#allocation11_spill] sm:$0xff] }
 0x11d   : > { %1141 = vrot.lane.b32.xlu1 %v3568_v24, %s2648_s6 }
 0x11e   : > { %1139 = vrot.lane.b32.xlu0 %v4440_v35, %s2648_s6  ;;  %1137 = vrot.lane.b32.xlu2 %v3091_v15, %s2648_s6 }
 0x11f   : > { %v991_v30 = vpop.permute.xlu1 %990 }
 0x120   : > { %1067 = vst.msk [vmem:[#allocation2 + $0x50] sm:$0xf] %vm1046_vm8, %v991_v30  ;;  %v989_v45 = vpop.permute.xlu0 %988  ;;  %v1005_v44 = vpop.permute.xlu2 %1004  ;;  %v4466_v30 = vld [vmem:[#allocation12_spill] sm:$0xff] }
 0x121   : > { %1066 = vst.msk [vmem:[#allocation2 + $0x4c] sm:$0xf] %vm1046_vm8, %v989_v45 }
 0x122   : > { %1074 = vst.msk [vmem:[#allocation2 + $0x6c] sm:$0xf] %vm1046_vm8, %v1005_v44 }
 0x125   : > { %1236 = vrot.lane.b32.xlu1 %v4463_v51, %s2649_s7  ;;  %v4467_v51 = vld [vmem:[#allocation9_spill] sm:$0xff] }
 0x126   : > { %1234 = vrot.lane.b32.xlu0 %v4464_v0, %s2649_s7  ;;  %1143 = vrot.lane.b32.xlu2 %v3583_v13, %s2648_s6  ;;  %s4156_s6 = scalar_lea.vmem [#allocation3], %s2359_s4 }
 0x127   : > { %v997_v6 = vpop.permute.xlu1 %996 }
 0x128   : > { %1070 = vst.msk [vmem:[#allocation2 + $0x5c] sm:$0xf] %vm1046_vm8, %v997_v6  ;;  %v995_v2 = vpop.permute.xlu0 %994  ;;  %v1011_v49 = vpop.permute.xlu2 %1010  ;;  %v4468_v6 = vld [vmem:[#allocation15_spill] sm:$0xff] }
 0x129   : > { %1069 = vst.msk [vmem:[#allocation2 + $0x58] sm:$0xf] %vm1046_vm8, %v995_v2  ;;  %v4469_v2 = vld [vmem:[#allocation16_spill] sm:$0xff] }
 0x12a   : > { %1077 = vst.msk [vmem:[#allocation2 + $0x78] sm:$0xf] %vm1046_vm8, %v1011_v49 }
 0x12d   : > { %1242 = vrot.lane.b32.xlu1 %v4465_v1, %s2649_s7  ;;  %v1214_v1 = vshll.u32 %v3568_v24, 16 }
 0x12e   : > { %1240 = vrot.lane.b32.xlu0 %v4466_v30, %s2649_s7  ;;  %1238 = vrot.lane.b32.xlu2 %v4467_v51, %s2649_s7 }
 0x12f   : > { %v1003_v45 = vpop.permute.xlu1 %1002  ;;  %v1216_v35 = vrot.slane %v1214_v1, 5 }
 0x130   : > { %1073 = vst.msk [vmem:[#allocation2 + $0x68] sm:$0xf] %vm1046_vm8, %v1003_v45  ;;  %v1001_v44 = vpop.permute.xlu0 %1000  ;;  %v1084_v0 = vpop.permute.xlu2 %1083 }
 0x131   : > { %1072 = vst.msk [vmem:[#allocation2 + $0x64] sm:$0xf] %vm1046_vm8, %v1001_v44  ;;  %v4471_v44 = vld [vmem:[#allocation20_spill] sm:$0xff] }
 0x132   : > { %1179 = vst.msk [vmem:[#allocation2 + $0x4] sm:$0xf] %vm1177_vm9, %v1084_v0  ;;  %v4472_v0 = vld [vmem:[#allocation21_spill] sm:$0xff] }
 0x135   : > { %1248 = vrot.lane.b32.xlu1 %v4468_v6, %s2649_s7 }
 0x136   : > { %1246 = vrot.lane.b32.xlu0 %v4469_v2, %s2649_s7  ;;  %1244 = vrot.lane.b32.xlu2 %v4470_v61, %s2649_s7 }
 0x137   : > { %v1009_v49 = vpop.permute.xlu1 %1008 }
 0x138   : > { %1076 = vst.msk [vmem:[#allocation2 + $0x74] sm:$0xf] %vm1046_vm8, %v1009_v49  ;;  %v1007_v45 = vpop.permute.xlu0 %1006  ;;  %v1090_v8 = vpop.permute.xlu2 %1089  ;;  %v4473_v49 = vld [vmem:[#allocation14_spill] sm:$0xff] }
 0x139   : > { %1075 = vst.msk [vmem:[#allocation2 + $0x70] sm:$0xf] %vm1046_vm8, %v1007_v45  ;;  %v4475_v45 = vld [vmem:[#allocation27_spill] sm:$0xff] }
 0x13a   : > { %1182 = vst.msk [vmem:[#allocation2 + $0x10] sm:$0xf] %vm1177_vm9, %v1090_v8  ;;  %v4474_v8 = vld [vmem:[#allocation26_spill] sm:$0xff] }
 0x13d   : > { %1254 = vrot.lane.b32.xlu1 %v4471_v44, %s2649_s7 }
 0x13e   : > { %1252 = vrot.lane.b32.xlu0 %v4472_v0, %s2649_s7  ;;  %1250 = vrot.lane.b32.xlu2 %v4473_v49, %s2649_s7 }
 0x13f   : > { %v1082_v36 = vpop.permute.xlu1 %1081 }
 0x140   : > { %1178 = vst.msk [vmem:[#allocation2] sm:$0xf] %vm1177_vm9, %v1082_v36  ;;  %v1013_v2 = vpop.permute.xlu0 %1012  ;;  %v1096_v6 = vpop.permute.xlu2 %1095  ;;  %v4476_v36 = vld [vmem:[#allocation19_spill] sm:$0xff] }
 0x141   : > { %1078 = vst.msk [vmem:[#allocation2 + $0x7c] sm:$0xf] %vm1046_vm8, %v1013_v2  ;;  %v4478_v2 = vld [vmem:[#allocation34_spill] sm:$0xff] }
 0x142   : > { %1185 = vst.msk [vmem:[#allocation2 + $0x1c] sm:$0xf] %vm1177_vm9, %v1096_v6  ;;  %v4477_v6 = vld [vmem:[#allocation33_spill] sm:$0xff] }
 0x145   : > { %1260 = vrot.lane.b32.xlu1 %v4474_v8, %s2649_s7 }
 0x146   : > { %1258 = vrot.lane.b32.xlu0 %v4475_v45, %s2649_s7  ;;  %1256 = vrot.lane.b32.xlu2 %v4476_v36, %s2649_s7 }
 0x147   : > { %v1088_v58 = vpop.permute.xlu1 %1087 }
 0x148   : > { %1181 = vst.msk [vmem:[#allocation2 + $0xc] sm:$0xf] %vm1177_vm9, %v1088_v58  ;;  %v1086_v0 = vpop.permute.xlu0 %1085  ;;  %v1102_v49 = vpop.permute.xlu2 %1101  ;;  %v4479_v58 = vld [vmem:[#allocation25_spill] sm:$0xff] }
 0x149   : > { %1180 = vst.msk [vmem:[#allocation2 + $0x8] sm:$0xf] %vm1177_vm9, %v1086_v0  ;;  %v4480_v0 = vld [vmem:[#allocation40_spill] sm:$0xff] }
 0x14a   : > { %1188 = vst.msk [vmem:[#allocation2 + $0x28] sm:$0xf] %vm1177_vm9, %v1102_v49  ;;  %v4481_v49 = vld [vmem:[#allocation41_spill] sm:$0xff] }
 0x14d   : > { %1266 = vrot.lane.b32.xlu1 %v4477_v6, %s2649_s7 }
 0x14e   : > { %1264 = vrot.lane.b32.xlu0 %v4478_v2, %s2649_s7  ;;  %1262 = vrot.lane.b32.xlu2 %v4479_v58, %s2649_s7 }
 0x14f   : > { %v1094_v21 = vpop.permute.xlu1 %1093 }
 0x150   : > { %1184 = vst.msk [vmem:[#allocation2 + $0x18] sm:$0xf] %vm1177_vm9, %v1094_v21  ;;  %v1092_v45 = vpop.permute.xlu0 %1091  ;;  %v1108_v8 = vpop.permute.xlu2 %1107  ;;  %v4482_v21 = vld [vmem:[#allocation32_spill] sm:$0xff] }
 0x151   : > { %1183 = vst.msk [vmem:[#allocation2 + $0x14] sm:$0xf] %vm1177_vm9, %v1092_v45 }
 0x152   : > { %1191 = vst.msk [vmem:[#allocation2 + $0x34] sm:$0xf] %vm1177_vm9, %v1108_v8 }
 0x155   : > { %1272 = vrot.lane.b32.xlu1 %v4480_v0, %s2649_s7 }
 0x156   : > { %1270 = vrot.lane.b32.xlu0 %v4481_v49, %s2649_s7  ;;  %1268 = vrot.lane.b32.xlu2 %v4482_v21, %s2649_s7  ;;  %v1220_v21 = vshll.u32 %v3583_v13, 16 }
 0x157   : > { %v1100_v6 = vpop.permute.xlu1 %1099 }
 0x158   : > { %1187 = vst.msk [vmem:[#allocation2 + $0x24] sm:$0xf] %vm1177_vm9, %v1100_v6  ;;  %v1098_v2 = vpop.permute.xlu0 %1097  ;;  %v1114_v58 = vpop.permute.xlu2 %1113  ;;  %v4483_v6 = vld [vmem:[#allocation38_spill] sm:$0xff] }
 0x159   : > { %1186 = vst.msk [vmem:[#allocation2 + $0x20] sm:$0xf] %vm1177_vm9, %v1098_v2 }
 0x15a   : > { %1194 = vst.msk [vmem:[#allocation2 + $0x40] sm:$0xf] %vm1177_vm9, %v1114_v58  ;;  %v1224_v58 = vshrl.u32 %v3583_v13, 16 }
 0x15c   : > { %v1226_v61 = vrot.slane %v1224_v58, 4 }
 0x15d   : > { %1278 = vrot.lane.b32.xlu1 %v3098_v41, %s2649_s7  ;;  %v1211_v41 = vshrl.u32 %v3568_v24, 16 }
 0x15e   : > { %1276 = vrot.lane.b32.xlu0 %v3106_v57, %s2649_s7  ;;  %1274 = vrot.lane.b32.xlu2 %v4483_v6, %s2649_s7  ;;  %v3664_v57 = vld [vmem:[%s2735_s30 + $0xc8] sm:$0x1]  ;;  %v4484_v6 = vld [vmem:[#allocation44_spill] sm:$0xff] }
 0x15f   : > { %v1106_v8 = vpop.permute.xlu1 %1105  ;;  %v1213_v15 = vrot.slane %v1211_v41, 4 }
 0x160   : > { %1190 = vst.msk [vmem:[#allocation2 + $0x30] sm:$0xf] %vm1177_vm9, %v1106_v8  ;;  %v1104_v45 = vpop.permute.xlu0 %1103  ;;  %v1120_v2 = vpop.permute.xlu2 %1119  ;;  %v1222_v8 = vrot.slane %v1220_v21, 5 }
 0x161   : > { %1189 = vst.msk [vmem:[#allocation2 + $0x2c] sm:$0xf] %vm1177_vm9, %v1104_v45 }
 0x162   : > { %1197 = vst.msk [vmem:[#allocation2 + $0x4c] sm:$0xf] %vm1177_vm9, %v1120_v2  ;;  %v1227_v3 = vor.u32 %v1226_v61, %v1222_v8 }
 0x164   : > { %v1228_v41 = vrot.slane %v1227_v3, 4 }
 0x165   : > { %1284 = vrot.lane.b32.xlu1 %v3126_v62, %s2649_s7  ;;  %v1230_v62 = vshll.u32 %v3664_v57, 16 }
 0x166   : > { %1282 = vrot.lane.b32.xlu0 %v3132_v28, %s2649_s7  ;;  %1280 = vrot.lane.b32.xlu2 %v4484_v6, %s2649_s7  ;;  %v1217_v28 = vor.u32 %v1216_v35, %v1213_v15 }
 0x167   : > { %v1112_v45 = vpop.permute.xlu1 %1111  ;;  %v1232_v1 = vrot.slane %v1230_v62, 5 }
 0x168   : > { %1193 = vst.msk [vmem:[#allocation2 + $0x3c] sm:$0xf] %vm1177_vm9, %v1112_v45  ;;  %v1110_v2 = vpop.permute.xlu0 %1109  ;;  %v1126_v34 = vpop.permute.xlu2 %1125  ;;  %v1218_v58 = vrot.slane %v1217_v28, 4 }
 0x169   : > { %1192 = vst.msk [vmem:[#allocation2 + $0x38] sm:$0xf] %vm1177_vm9, %v1110_v2 }
 0x16a   : > { %1200 = vst.msk [vmem:[#allocation2 + $0x58] sm:$0xf] %vm1177_vm9, %v1126_v34  ;;  %v3682_v34 = vsel %vm2771_vm2, %v1228_v41, %v1232_v1  ;;  %v3686_v15 = vsel %vm2771_vm2, %v1218_v58, %v1222_v8  ;;  %v4485_v1 = vld [vmem:[#allocation53_spill] sm:$0xff] }
 0x16d   : > { %1290 = vrot.lane.b32.xlu1 %v3145_v50, %s2649_s7 }
 0x16e   : > { %1288 = vrot.lane.b32.xlu0 %v3152_v48, %s2649_s7  ;;  %1286 = vrot.lane.b32.xlu2 %v3118_v40, %s2649_s7 }
 0x16f   : > { %v1118_v21 = vpop.permute.xlu1 %1117 }
 0x170   : > { %1196 = vst.msk [vmem:[#allocation2 + $0x48] sm:$0xf] %vm1177_vm9, %v1118_v21  ;;  %v1116_v45 = vpop.permute.xlu0 %1115  ;;  %v1132_v61 = vpop.permute.xlu2 %1131 }
 0x171   : > { %1195 = vst.msk [vmem:[#allocation2 + $0x44] sm:$0xf] %vm1177_vm9, %v1116_v45  ;;  %v4486_v45 = vld [vmem:[#allocation50_spill] sm:$0xff] }
 0x172   : > { %1203 = vst.msk [vmem:[#allocation2 + $0x64] sm:$0xf] %vm1177_vm9, %v1132_v61 }
 0x175   : > { %1296 = vrot.lane.b32.xlu1 %v3682_v34, %s2649_s7 }
 0x176   : > { %1294 = vrot.lane.b32.xlu0 %v3686_v15, %s2649_s7  ;;  %1292 = vrot.lane.b32.xlu2 %v3141_v20, %s2649_s7  ;;  %s2490_s7 = sshll.u32 %s2636_s15, 8  ;;  %s2264_s15 = scalar_lea.sflag [#allocation4], %s175_s28 }
 0x177   : > { %v1124_v3 = vpop.permute.xlu1 %1123 }
 0x178   : > { %1199 = vst.msk [vmem:[#allocation2 + $0x54] sm:$0xf] %vm1177_vm9, %v1124_v3  ;;  %v1122_v62 = vpop.permute.xlu0 %1121  ;;  %v1138_v28 = vpop.permute.xlu2 %1137  ;;  %v4487_v3 = vld [vmem:[#allocation54_spill] sm:$0xff] }
 0x179   : > { %1198 = vst.msk [vmem:[#allocation2 + $0x50] sm:$0xf] %vm1177_vm9, %v1122_v62  ;;  %v4488_v62 = vld [vmem:[#allocation55_spill] sm:$0xff] }
 0x17a   : > { %1206 = vst.msk [vmem:[#allocation2 + $0x70] sm:$0xf] %vm1177_vm9, %v1138_v28 }
 0x17d   : > { %1375 = vrot.lane.b32.xlu1 %v3212_v12, %s2650_s8 }
 0x17e   : > { %1373 = vrot.lane.b32.xlu0 %v3223_v10, %s2650_s8  ;;  %1371 = vrot.lane.b32.xlu2 %v3174_v59, %s2650_s8 }
 0x17f   : > { %v1130_v35 = vpop.permute.xlu1 %1129 }
 0x180   : > { %1202 = vst.msk [vmem:[#allocation2 + $0x60] sm:$0xf] %vm1177_vm9, %v1130_v35  ;;  %v1128_v8 = vpop.permute.xlu0 %1127  ;;  %v1144_v2 = vpop.permute.xlu2 %1143 }
 0x181   : > { %1201 = vst.msk [vmem:[#allocation2 + $0x5c] sm:$0xf] %vm1177_vm9, %v1128_v8  ;;  %v4489_v8 = vld [vmem:[#allocation51_spill] sm:$0xff] }
 0x182   : > { %1209 = vst.msk [vmem:[#allocation2 + $0x7c] sm:$0xf] %vm1177_vm9, %v1144_v2 }
 0x185   : > { %1381 = vrot.lane.b32.xlu1 %v3252_v17, %s2650_s8 }
 0x186   : > { %1379 = vrot.lane.b32.xlu0 %v3263_v18, %s2650_s8  ;;  %1377 = vrot.lane.b32.xlu2 %v3206_v4, %s2650_s8 }
 0x187   : > { %v1136_v41 = vpop.permute.xlu1 %1135 }
 0x188   : > { %1205 = vst.msk [vmem:[#allocation2 + $0x6c] sm:$0xf] %vm1177_vm9, %v1136_v41  ;;  %v1134_v10 = vpop.permute.xlu0 %1133  ;;  %v1239_v59 = vpop.permute.xlu2 %1238  ;;  %v4490_v41 = vld [vmem:[#allocation17_spill] sm:$0xff] }
 0x189   : > { %1204 = vst.msk [vmem:[#allocation2 + $0x68] sm:$0xf] %vm1177_vm9, %v1134_v10  ;;  %v4491_v10 = vld [vmem:[#allocation56_spill] sm:$0xff] }
 0x18a   : > { %1333 = vst.msk [vmem:[#allocation2 + $0x8] sm:$0xf] %vm1330_vm10, %v1239_v59 }
 0x18d   : > { %1387 = vrot.lane.b32.xlu1 %v3288_v25, %s2650_s8 }
 0x18e   : > { %1385 = vrot.lane.b32.xlu0 %v4485_v1, %s2650_s8  ;;  %1383 = vrot.lane.b32.xlu2 %v4486_v45, %s2650_s8 }
 0x18f   : > { %v1142_v21 = vpop.permute.xlu1 %1141 }
 0x190   : > { %1208 = vst.msk [vmem:[#allocation2 + $0x78] sm:$0xf] %vm1177_vm9, %v1142_v21  ;;  %v1140_v58 = vpop.permute.xlu0 %1139  ;;  %v1245_v61 = vpop.permute.xlu2 %1244 }
 0x191   : > { %1207 = vst.msk [vmem:[#allocation2 + $0x74] sm:$0xf] %vm1177_vm9, %v1140_v58  ;;  %v4492_v58 = vld [vmem:[#allocation13_spill] sm:$0xff] }
 0x192   : > { %1336 = vst.msk [vmem:[#allocation2 + $0x14] sm:$0xf] %vm1330_vm10, %v1245_v61 }
 0x195   : > { %1393 = vrot.lane.b32.xlu1 %v4487_v3, %s2650_s8 }
 0x196   : > { %1391 = vrot.lane.b32.xlu0 %v4488_v62, %s2650_s8  ;;  %1389 = vrot.lane.b32.xlu2 %v4489_v8, %s2650_s8 }
 0x197   : > { %v1237_v28 = vpop.permute.xlu1 %1236 }
 0x198   : > { %1332 = vst.msk [vmem:[#allocation2 + $0x4] sm:$0xf] %vm1330_vm10, %v1237_v28  ;;  %v1235_v35 = vpop.permute.xlu0 %1234  ;;  %v1251_v2 = vpop.permute.xlu2 %1250  ;;  %v4493_v28 = vld [vmem:[#allocation58_spill] sm:$0xff] }
 0x199   : > { %1331 = vst.msk [vmem:[#allocation2] sm:$0xf] %vm1330_vm10, %v1235_v35 }
 0x19a   : > { %1339 = vst.msk [vmem:[#allocation2 + $0x20] sm:$0xf] %vm1330_vm10, %v1251_v2 }
 0x19d   : > { %1399 = vrot.lane.b32.xlu1 %v4490_v41, %s2650_s8 }
 0x19e   : > { %1397 = vrot.lane.b32.xlu0 %v4491_v10, %s2650_s8  ;;  %1395 = vrot.lane.b32.xlu2 %v4492_v58, %s2650_s8 }
 0x19f   : > { %v1243_v59 = vpop.permute.xlu1 %1242 }
 0x1a0   : > { %1335 = vst.msk [vmem:[#allocation2 + $0x10] sm:$0xf] %vm1330_vm10, %v1243_v59  ;;  %v1241_v21 = vpop.permute.xlu0 %1240  ;;  %v1257_v61 = vpop.permute.xlu2 %1256  ;;  %v4494_v59 = vld [vmem:[#allocation24_spill] sm:$0xff] }
 0x1a1   : > { %1334 = vst.msk [vmem:[#allocation2 + $0xc] sm:$0xf] %vm1330_vm10, %v1241_v21  ;;  %v4495_v21 = vld [vmem:[#allocation30_spill] sm:$0xff] }
 0x1a2   : > { %1342 = vst.msk [vmem:[#allocation2 + $0x2c] sm:$0xf] %vm1330_vm10, %v1257_v61  ;;  %v4496_v61 = vld [vmem:[#allocation59_spill] sm:$0xff] }
 0x1a5   : > { %1405 = vrot.lane.b32.xlu1 %v3376_v46, %s2650_s8 }
 0x1a6   : > { %1403 = vrot.lane.b32.xlu0 %v4493_v28, %s2650_s8  ;;  %1401 = vrot.lane.b32.xlu2 %v4494_v59, %s2650_s8 }
 0x1a7   : > { %v1249_v35 = vpop.permute.xlu1 %1248 }
 0x1a8   : > { %1338 = vst.msk [vmem:[#allocation2 + $0x1c] sm:$0xf] %vm1330_vm10, %v1249_v35  ;;  %v1247_v2 = vpop.permute.xlu0 %1246  ;;  %v1263_v25 = vpop.permute.xlu2 %1262  ;;  %v4497_v35 = vld [vmem:[#allocation22_spill] sm:$0xff] }
 0x1a9   : > { %1337 = vst.msk [vmem:[#allocation2 + $0x18] sm:$0xf] %vm1330_vm10, %v1247_v2 }
 0x1aa   : > { %1345 = vst.msk [vmem:[#allocation2 + $0x38] sm:$0xf] %vm1330_vm10, %v1263_v25 }
 0x1ad   : > { %1411 = vrot.lane.b32.xlu1 %v4495_v21, %s2650_s8 }
 0x1ae   : > { %1409 = vrot.lane.b32.xlu0 %v4496_v61, %s2650_s8  ;;  %1407 = vrot.lane.b32.xlu2 %v4497_v35, %s2650_s8 }
 0x1af   : > { %v1255_v46 = vpop.permute.xlu1 %1254 }
 0x1b0   : > { %1341 = vst.msk [vmem:[#allocation2 + $0x28] sm:$0xf] %vm1330_vm10, %v1255_v46  ;;  %v1253_v28 = vpop.permute.xlu0 %1252  ;;  %v1269_v8 = vpop.permute.xlu2 %1268  ;;  %v4498_v46 = vld [vmem:[#allocation37_spill] sm:$0xff] }
 0x1b1   : > { %1340 = vst.msk [vmem:[#allocation2 + $0x24] sm:$0xf] %vm1330_vm10, %v1253_v28 }
 0x1b2   : > { %1348 = vst.msk [vmem:[#allocation2 + $0x44] sm:$0xf] %vm1330_vm10, %v1269_v8 }
 0x1b5   : > { %1417 = vrot.lane.b32.xlu1 %v3427_v14, %s2650_s8 }
 0x1b6   : > { %1415 = vrot.lane.b32.xlu0 %v3434_v52, %s2650_s8  ;;  %1413 = vrot.lane.b32.xlu2 %v4498_v46, %s2650_s8 }
 0x1b7   : > { %v1261_v25 = vpop.permute.xlu1 %1260 }
 0x1b8   : > { %1344 = vst.msk [vmem:[#allocation2 + $0x34] sm:$0xf] %vm1330_vm10, %v1261_v25  ;;  %v1259_v2 = vpop.permute.xlu0 %1258  ;;  %v1275_v27 = vpop.permute.xlu2 %1274  ;;  %v4499_v25 = vld [vmem:[#allocation35_spill] sm:$0xff] }
 0x1b9   : > { %1343 = vst.msk [vmem:[#allocation2 + $0x30] sm:$0xf] %vm1330_vm10, %v1259_v2  ;;  %v1366_v2 = vrot.slane %v3583_v13, 5 }
 0x1ba   : > { %1351 = vst.msk [vmem:[#allocation2 + $0x50] sm:$0xf] %vm1330_vm10, %v1275_v27 }
 0x1bd   : > { %1423 = vrot.lane.b32.xlu1 %v3451_v54, %s2650_s8 }
 0x1be   : > { %1421 = vrot.lane.b32.xlu0 %v3459_v9, %s2650_s8  ;;  %1419 = vrot.lane.b32.xlu2 %v4499_v25, %s2650_s8  ;;  %v1368_v9 = vrot.slane %v1366_v2, 4 }
 0x1bf   : > { %v1267_v8 = vpop.permute.xlu1 %1266 }
 0x1c0   : > { %1347 = vst.msk [vmem:[#allocation2 + $0x40] sm:$0xf] %vm1330_vm10, %v1267_v8  ;;  %v1265_v28 = vpop.permute.xlu0 %1264  ;;  %v1281_v41 = vpop.permute.xlu2 %1280  ;;  %v1369_v8 = vrot.slane %v3664_v57, 5 }
 0x1c1   : > { %1346 = vst.msk [vmem:[#allocation2 + $0x3c] sm:$0xf] %vm1330_vm10, %v1265_v28 }
 0x1c2   : > { %1354 = vst.msk [vmem:[#allocation2 + $0x5c] sm:$0xf] %vm1330_vm10, %v1281_v41  ;;  %v2377_v41 = vrot.slane %v3568_v24, 9  ;;  %v3792_v59 = vsel %vm3158_vm6, %v1368_v9, %v1369_v8 }
 0x1c4   : > { %v3799_v57 = vsel %vm3158_vm6, %v2377_v41, %v1366_v2  ;;  %v4500_v41 = vld [vmem:[#allocation29_spill] sm:$0xff] }
 0x1c5   : > { %1429 = vrot.lane.b32.xlu1 %v3471_v55, %s2650_s8 }
 0x1c6   : > { %1427 = vrot.lane.b32.xlu0 %v3478_v39, %s2650_s8  ;;  %1425 = vrot.lane.b32.xlu2 %v3447_v60, %s2650_s8 }
 0x1c7   : > { %v1273_v27 = vpop.permute.xlu1 %1272 }
 0x1c8   : > { %1350 = vst.msk [vmem:[#allocation2 + $0x4c] sm:$0xf] %vm1330_vm10, %v1273_v27  ;;  %v1271_v25 = vpop.permute.xlu0 %1270  ;;  %v1287_v28 = vpop.permute.xlu2 %1286 }
 0x1c9   : > { %1349 = vst.msk [vmem:[#allocation2 + $0x48] sm:$0xf] %vm1330_vm10, %v1271_v25 }
 0x1ca   : > { %1357 = vst.msk [vmem:[#allocation2 + $0x68] sm:$0xf] %vm1330_vm10, %v1287_v28 }
 0x1cd   : > { %1502 = vrot.lane.b32.xlu1 %v2780_v37, %s2651_s9 }
 0x1ce   : > { %1433 = vrot.lane.b32.xlu0 %v3792_v59, %s2650_s8  ;;  %1431 = vrot.lane.b32.xlu2 %v3799_v57, %s2650_s8 }
 0x1cf   : > { %v1279_v25 = vpop.permute.xlu1 %1278 }
 0x1d0   : > { %1353 = vst.msk [vmem:[#allocation2 + $0x58] sm:$0xf] %vm1330_vm10, %v1279_v25  ;;  %v1277_v27 = vpop.permute.xlu0 %1276  ;;  %v1293_v9 = vpop.permute.xlu2 %1292  ;;  %v4502_v25 = vld [vmem:[#allocation38_spill] sm:$0xff] }
 0x1d1   : > { %1352 = vst.msk [vmem:[#allocation2 + $0x54] sm:$0xf] %vm1330_vm10, %v1277_v27  ;;  %v4503_v27 = vld [vmem:[#allocation43_spill] sm:$0xff] }
 0x1d2   : > { %1360 = vst.msk [vmem:[#allocation2 + $0x74] sm:$0xf] %vm1330_vm10, %v1293_v9 }
 0x1d5   : > { %1508 = vrot.lane.b32.xlu1 %v2765_v22, %s2651_s9 }
 0x1d6   : > { %1506 = vrot.lane.b32.xlu0 %v2777_v31, %s2651_s9  ;;  %1504 = vrot.lane.b32.xlu2 %v2791_v42, %s2651_s9 }
 0x1d7   : > { %v1285_v37 = vpop.permute.xlu1 %1284 }
 0x1d8   : > { %1356 = vst.msk [vmem:[#allocation2 + $0x64] sm:$0xf] %vm1330_vm10, %v1285_v37  ;;  %v1283_v2 = vpop.permute.xlu0 %1282  ;;  %v1372_v8 = vpop.permute.xlu2 %1371 }
 0x1d9   : > { %1355 = vst.msk [vmem:[#allocation2 + $0x60] sm:$0xf] %vm1330_vm10, %v1283_v2  ;;  %v4504_v2 = vld [vmem:[#allocation45_spill] sm:$0xff] }
 0x1da   : > { %1468 = vst.msk [vmem:[#allocation2] sm:$0xf] %vm1467_vm11, %v1372_v8 }
 0x1dd   : > { %1514 = vrot.lane.b32.xlu1 %v2805_v53, %s2651_s9 }
 0x1de   : > { %1512 = vrot.lane.b32.xlu0 %v2809_v56, %s2651_s9  ;;  %1510 = vrot.lane.b32.xlu2 %v2844_v29, %s2651_s9 }
 0x1df   : > { %v1291_v22 = vpop.permute.xlu1 %1290 }
 0x1e0   : > { %1359 = vst.msk [vmem:[#allocation2 + $0x70] sm:$0xf] %vm1330_vm10, %v1291_v22  ;;  %v1289_v31 = vpop.permute.xlu0 %1288  ;;  %v1378_v42 = vpop.permute.xlu2 %1377 }
 0x1e1   : > { %1358 = vst.msk [vmem:[#allocation2 + $0x6c] sm:$0xf] %vm1330_vm10, %v1289_v31  ;;  %v4505_v31 = vld [vmem:[#allocation47_spill] sm:$0xff] }
 0x1e2   : > { %1471 = vst.msk [vmem:[#allocation2 + $0xc] sm:$0xf] %vm1467_vm11, %v1378_v42 }
 0x1e5   : > { %1520 = vrot.lane.b32.xlu1 %v2830_v16, %s2651_s9 }
 0x1e6   : > { %1518 = vrot.lane.b32.xlu0 %v2851_v33, %s2651_s9  ;;  %1516 = vrot.lane.b32.xlu2 %v2834_v19, %s2651_s9 }
 0x1e7   : > { %v1297_v53 = vpop.permute.xlu1 %1296 }
 0x1e8   : > { %1362 = vst.msk [vmem:[#allocation2 + $0x7c] sm:$0xf] %vm1330_vm10, %v1297_v53  ;;  %v1295_v56 = vpop.permute.xlu0 %1294  ;;  %v1384_v29 = vpop.permute.xlu2 %1383 }
 0x1e9   : > { %1361 = vst.msk [vmem:[#allocation2 + $0x78] sm:$0xf] %vm1330_vm10, %v1295_v56  ;;  %v4506_v56 = vld [vmem:[#allocation10_spill] sm:$0xff] }
 0x1ea   : > { %1474 = vst.msk [vmem:[#allocation2 + $0x18] sm:$0xf] %vm1467_vm11, %v1384_v29 }
 0x1ed   : > { %1526 = vrot.lane.b32.xlu1 %v2880_v7, %s2651_s9 }
 0x1ee   : > { %1524 = vrot.lane.b32.xlu0 %v2886_v11, %s2651_s9  ;;  %1522 = vrot.lane.b32.xlu2 %v2899_v26, %s2651_s9 }
 0x1ef   : > { %v1376_v16 = vpop.permute.xlu1 %1375 }
 0x1f0   : > { %1470 = vst.msk [vmem:[#allocation2 + $0x8] sm:$0xf] %vm1467_vm11, %v1376_v16  ;;  %v1374_v33 = vpop.permute.xlu0 %1373  ;;  %v1390_v19 = vpop.permute.xlu2 %1389  ;;  %v4508_v16 = vld [vmem:[#allocation26_spill] sm:$0xff] }
 0x1f1   : > { %1469 = vst.msk [vmem:[#allocation2 + $0x4] sm:$0xf] %vm1467_vm11, %v1374_v33 }
 0x1f2   : > { %1477 = vst.msk [vmem:[#allocation2 + $0x24] sm:$0xf] %vm1467_vm11, %v1390_v19 }
 0x1f5   : > { %1534 = vrot.lane.b32.xlu1 %v2977_v32, %s2651_s9 }
 0x1f6   : > { %1530 = vrot.lane.b32.xlu0 %v2935_v63, %s2651_s9  ;;  %1528 = vrot.lane.b32.xlu2 %v2914_v43, %s2651_s9 }
 0x1f7   : > { %v1382_v7 = vpop.permute.xlu1 %1381 }
 0x1f8   : > { %1473 = vst.msk [vmem:[#allocation2 + $0x14] sm:$0xf] %vm1467_vm11, %v1382_v7  ;;  %v1380_v11 = vpop.permute.xlu0 %1379  ;;  %v1396_v26 = vpop.permute.xlu2 %1395  ;;  %v4509_v7 = vld [vmem:[#allocation27_spill] sm:$0xff] }
 0x1f9   : > { %1472 = vst.msk [vmem:[#allocation2 + $0x10] sm:$0xf] %vm1467_vm11, %v1380_v11 }
 0x1fa   : > { %1480 = vst.msk [vmem:[#allocation2 + $0x30] sm:$0xf] %vm1467_vm11, %v1396_v26 }
 0x1fd   : > { %1552 = vrot.lane.b32.xlu1 %v3071_v23, %s2651_s9 }
 0x1fe   : > { %1550 = vrot.lane.b32.xlu0 %v3037_v38, %s2651_s9  ;;  %1536 = vrot.lane.b32.xlu2 %v2964_v5, %s2651_s9 }
 0x1ff   : > { %v1388_v32 = vpop.permute.xlu1 %1387 }
 0x200   : > { %1476 = vst.msk [vmem:[#allocation2 + $0x20] sm:$0xf] %vm1467_vm11, %v1388_v32  ;;  %v1386_v63 = vpop.permute.xlu0 %1385  ;;  %v1402_v43 = vpop.permute.xlu2 %1401 }
 0x201   : > { %1475 = vst.msk [vmem:[#allocation2 + $0x1c] sm:$0xf] %vm1467_vm11, %v1386_v63 }
 0x202   : > { %1483 = vst.msk [vmem:[#allocation2 + $0x3c] sm:$0xf] %vm1467_vm11, %v1402_v43 }
 0x205   : > { %1703 = vrot.lane.b32.xlu1 %v3118_v40, %s2652_s10 }
 0x206   : > { %1689 = vrot.lane.b32.xlu0 %v4480_v0, %s2652_s10  ;;  %1687 = vrot.lane.b32.xlu2 %v4481_v49, %s2652_s10 }
 0x207   : > { %v1394_v38 = vpop.permute.xlu1 %1393 }
 0x208   : > { %1479 = vst.msk [vmem:[#allocation2 + $0x2c] sm:$0xf] %vm1467_vm11, %v1394_v38  ;;  %v1392_v23 = vpop.permute.xlu0 %1391  ;;  %v1408_v5 = vpop.permute.xlu2 %1407 }
 0x209   : > { %1478 = vst.msk [vmem:[#allocation2 + $0x28] sm:$0xf] %vm1467_vm11, %v1392_v23 }
 0x20a   : > { %1486 = vst.msk [vmem:[#allocation2 + $0x48] sm:$0xf] %vm1467_vm11, %v1408_v5 }
 0x20d   : > { %1826 = vrot.lane.b32.xlu1 %v4496_v61, %s2653_s11 }
 0x20e   : > { %1824 = vrot.lane.b32.xlu0 %v4497_v35, %s2653_s11  ;;  %1705 = vrot.lane.b32.xlu2 %v3152_v48, %s2652_s10 }
 0x20f   : > { %v1400_v40 = vpop.permute.xlu1 %1399 }
 0x210   : > { %1482 = vst.msk [vmem:[#allocation2 + $0x38] sm:$0xf] %vm1467_vm11, %v1400_v40  ;;  %v1398_v0 = vpop.permute.xlu0 %1397  ;;  %v1414_v49 = vpop.permute.xlu2 %1413  ;;  %v4511_v40 = vld [vmem:[#allocation31_spill] sm:$0xff] }
 0x211   : > { %1481 = vst.msk [vmem:[#allocation2 + $0x34] sm:$0xf] %vm1467_vm11, %v1398_v0  ;;  %v4512_v0 = vld [vmem:[#allocation46_spill] sm:$0xff] }
 0x212   : > { %1489 = vst.msk [vmem:[#allocation2 + $0x54] sm:$0xf] %vm1467_vm11, %v1414_v49 }
 0x215   : > { %1655 = vrot.lane.b32.xlu1 %v4467_v51, %s2652_s10 }
 0x216   : > { %1842 = vrot.lane.b32.xlu0 %v3447_v60, %s2653_s11  ;;  %1840 = vrot.lane.b32.xlu2 %v3451_v54, %s2653_s11 }
 0x217   : > { %v1406_v61 = vpop.permute.xlu1 %1405 }
 0x218   : > { %1485 = vst.msk [vmem:[#allocation2 + $0x44] sm:$0xf] %vm1467_vm11, %v1406_v61  ;;  %v1404_v35 = vpop.permute.xlu0 %1403  ;;  %v1420_v48 = vpop.permute.xlu2 %1419 }
 0x219   : > { %1484 = vst.msk [vmem:[#allocation2 + $0x40] sm:$0xf] %vm1467_vm11, %v1404_v35 }
 0x21a   : > { %1492 = vst.msk [vmem:[#allocation2 + $0x60] sm:$0xf] %vm1467_vm11, %v1420_v48 }
 0x21d   : > { %1673 = vrot.lane.b32.xlu1 %v4476_v36, %s2652_s10 }
 0x21e   : > { %1671 = vrot.lane.b32.xlu0 %v4471_v44, %s2652_s10  ;;  %1657 = vrot.lane.b32.xlu2 %v4466_v30, %s2652_s10 }
 0x21f   : > { %v1412_v51 = vpop.permute.xlu1 %1411 }
 0x220   : > { %1488 = vst.msk [vmem:[#allocation2 + $0x50] sm:$0xf] %vm1467_vm11, %v1412_v51  ;;  %v1410_v60 = vpop.permute.xlu0 %1409  ;;  %v1426_v54 = vpop.permute.xlu2 %1425  ;;  %v4513_v51 = vld [vmem:[#allocation25_spill] sm:$0xff] }
 0x221   : > { %1487 = vst.msk [vmem:[#allocation2 + $0x4c] sm:$0xf] %vm1467_vm11, %v1410_v60  ;;  %v4514_v60 = vld [vmem:[#allocation15_spill] sm:$0xff] }
 0x222   : > { %1495 = vst.msk [vmem:[#allocation2 + $0x6c] sm:$0xf] %vm1467_vm11, %v1426_v54 }
 0x225   : > { %1808 = vrot.lane.b32.xlu1 %v4488_v62, %s2653_s11  ;;  %v4501_v62 = vld [vmem:[#allocation23_spill] sm:$0xff] }
 0x226   : > { %1794 = vrot.lane.b32.xlu0 %v3206_v4, %s2653_s11  ;;  %1792 = vrot.lane.b32.xlu2 %v3212_v12, %s2653_s11 }
 0x227   : > { %v1418_v36 = vpop.permute.xlu1 %1417 }
 0x228   : > { %1491 = vst.msk [vmem:[#allocation2 + $0x5c] sm:$0xf] %vm1467_vm11, %v1418_v36  ;;  %v1416_v44 = vpop.permute.xlu0 %1415  ;;  %v1432_v30 = vpop.permute.xlu2 %1431  ;;  %v4515_v36 = vld [vmem:[#allocation16_spill] sm:$0xff] }
 0x229   : > { %1490 = vst.msk [vmem:[#allocation2 + $0x58] sm:$0xf] %vm1467_vm11, %v1416_v44 }
 0x22a   : > { %1498 = vst.msk [vmem:[#allocation2 + $0x78] sm:$0xf] %vm1467_vm11, %v1432_v30  ;;  %v4029_v30 = vld [vmem:[%s2735_s30 + $0xcc] sm:$0xf] }
 0x22d   : > { %1540 = vrot.lane.b32.xlu1 %v4500_v41, %s2651_s9 }
 0x22e   : > { %1538 = vrot.lane.b32.xlu0 %v4501_v62, %s2651_s9  ;;  %1810 = vrot.lane.b32.xlu2 %v4487_v3, %s2653_s11 }
 0x22f   : > { %v1424_v28 = vpop.permute.xlu1 %1423 }
 0x230   : > { %1494 = vst.msk [vmem:[#allocation2 + $0x68] sm:$0xf] %vm1467_vm11, %v1424_v28  ;;  %v1422_v4 = vpop.permute.xlu0 %1421  ;;  %v1505_v12 = vpop.permute.xlu2 %1504  ;;  %v4516_v28 = vld [vmem:[#allocation34_spill] sm:$0xff] }
 0x231   : > { %1493 = vst.msk [vmem:[#allocation2 + $0x64] sm:$0xf] %vm1467_vm11, %v1422_v4 }
 0x232   : > { %1600 = vst.msk [vmem:[#allocation2 + $0x4] sm:$0xf] %vm1598_vm12, %v1505_v12  ;;  %v4517_v12 = vld [vmem:[#allocation39_spill] sm:$0xff] }
 0x235   : > { %1691 = vrot.lane.b32.xlu1 %v4502_v25, %s2652_s10  ;;  %v4518_v25 = vld [vmem:[#allocation24_spill] sm:$0xff] }
 0x236   : > { %1556 = vrot.lane.b32.xlu0 %v4503_v27, %s2651_s9  ;;  %1554 = vrot.lane.b32.xlu2 %v4504_v2, %s2651_s9 }
 0x237   : > { %v1430_v9 = vpop.permute.xlu1 %1429 }
 0x238   : > { %1497 = vst.msk [vmem:[#allocation2 + $0x74] sm:$0xf] %vm1467_vm11, %v1430_v9  ;;  %v1428_v37 = vpop.permute.xlu0 %1427  ;;  %v1511_v3 = vpop.permute.xlu2 %1510 }
 0x239   : > { %1496 = vst.msk [vmem:[#allocation2 + $0x70] sm:$0xf] %vm1467_vm11, %v1428_v37 }
 0x23a   : > { %1603 = vst.msk [vmem:[#allocation2 + $0x10] sm:$0xf] %vm1598_vm12, %v1511_v3  ;;  %v4519_v3 = vld [vmem:[#allocation17_spill] sm:$0xff] }
 0x23d   : > { %1709 = vrot.lane.b32.xlu1 %v3141_v20, %s2652_s10 }
 0x23e   : > { %1707 = vrot.lane.b32.xlu0 %v3145_v50, %s2652_s10  ;;  %1693 = vrot.lane.b32.xlu2 %v4505_v31, %s2652_s10 }
 0x23f   : > { %v1503_v8 = vpop.permute.xlu1 %1502 }
 0x240   : > { %1599 = vst.msk [vmem:[#allocation2] sm:$0xf] %vm1598_vm12, %v1503_v8  ;;  %v1434_v22 = vpop.permute.xlu0 %1433  ;;  %v1517_v42 = vpop.permute.xlu2 %1516  ;;  %v236_v8 = vld [vmem:[%s2735_s30 + $0xd0] sm:$0xf] }
 0x241   : > { %1499 = vst.msk [vmem:[#allocation2 + $0x7c] sm:$0xf] %vm1467_vm11, %v1434_v22  ;;  %v1641_v22 = vshll.u32 %v236_v8, 16 }
 0x242   : > { %1606 = vst.msk [vmem:[#allocation2 + $0x1c] sm:$0xf] %vm1598_vm12, %v1517_v42 }
 0x245   : > { %1844 = vrot.lane.b32.xlu1 %v3478_v39, %s2653_s11  ;;  %v4507_v39 = vld [vmem:[#allocation11_spill] sm:$0xff] }
 0x246   : > { %1830 = vrot.lane.b32.xlu0 %v4498_v46, %s2653_s11  ;;  %1828 = vrot.lane.b32.xlu2 %v4495_v21, %s2653_s11 }
 0x247   : > { %v1509_v20 = vpop.permute.xlu1 %1508 }
 0x248   : > { %1602 = vst.msk [vmem:[#allocation2 + $0xc] sm:$0xf] %vm1598_vm12, %v1509_v20  ;;  %v1507_v50 = vpop.permute.xlu0 %1506  ;;  %v1523_v53 = vpop.permute.xlu2 %1522  ;;  %v1645_v20 = vshrl.u32 %v236_v8, 16 }
 0x249   : > { %1601 = vst.msk [vmem:[#allocation2 + $0x8] sm:$0xf] %vm1598_vm12, %v1507_v50 }
 0x24a   : > { %1609 = vst.msk [vmem:[#allocation2 + $0x28] sm:$0xf] %vm1598_vm12, %v1523_v53  ;;  %v1643_v53 = vrot.slane %v1641_v22, 5 }
 0x24d   : > { %1661 = vrot.lane.b32.xlu1 %v4506_v56, %s2652_s10 }
 0x24e   : > { %1659 = vrot.lane.b32.xlu0 %v4507_v39, %s2652_s10  ;;  %1846 = vrot.lane.b32.xlu2 %v3471_v55, %s2653_s11  ;;  %v1957_v55 = vld [vmem:[%s4283_s1 + $0x10] sm:$0x3] }
 0x24f   : > { %v1515_v29 = vpop.permute.xlu1 %1514  ;;  %v2051_v26 = vunpack.c.l.b16 %v1957_v55  ;;  %v237_v55 = vld [vmem:[%s2735_s30 + $0xd4] sm:$0x1] }
 0x250   : > { %1605 = vst.msk [vmem:[#allocation2 + $0x18] sm:$0xf] %vm1598_vm12, %v1515_v29  ;;  %v1513_v46 = vpop.permute.xlu0 %1512  ;;  %v1529_v21 = vpop.permute.xlu2 %1528 }
 0x251   : > { %1604 = vst.msk [vmem:[#allocation2 + $0x14] sm:$0xf] %vm1598_vm12, %v1513_v46 }
 0x252   : > { %1612 = vst.msk [vmem:[#allocation2 + $0x34] sm:$0xf] %vm1598_vm12, %v1529_v21  ;;  %v4520_v21 = vld [vmem:[#allocation36_spill] sm:$0xff] }
 0x255   : > { %1796 = vrot.lane.b32.xlu1 %v3263_v18, %s2653_s11  ;;  %v2054_v18 = vpack.c.b16 %v2051_v26, %v2051_v26  ;;  %v1651_v26 = vshll.u32 %v237_v55, 16 }
 0x256   : > { %1677 = vrot.lane.b32.xlu0 %v4508_v16, %s2652_s10  ;;  %1675 = vrot.lane.b32.xlu2 %v4509_v7, %s2652_s10  ;;  %v1647_v16 = vrot.slane %v1645_v20, 4 }
 0x257   : > { %v1521_v33 = vpop.permute.xlu1 %1520  ;;  %v2108_v32 = vsel %vm2106_vm13, %v2054_v18, 0  ;;  %v4522_v18 = vld [vmem:[#allocation48_spill] sm:$0xff] }
 0x258   : > { %1608 = vst.msk [vmem:[#allocation2 + $0x24] sm:$0xf] %vm1598_vm12, %v1521_v33  ;;  %v1519_v19 = vpop.permute.xlu0 %1518  ;;  %v1537_v11 = vpop.permute.xlu2 %1536  ;;  %2492 = vmatpush.bf16.msra.mxu2 %v2108_v32  ;;  %2493 = vmatpush.bf16.msra.mxu3 %v2108_v32 }
 0x259   : > { %1607 = vst.msk [vmem:[#allocation2 + $0x20] sm:$0xf] %vm1598_vm12, %v1519_v19  ;;  %2115 = vmatpush.bf16.msra.mxu0 %v2108_v32  ;;  %2491 = vmatpush.bf16.msra.mxu1 %v2108_v32 }
 0x25a   : > { %1616 = vst.msk [vmem:[#allocation2 + $0x44] sm:$0xf] %vm1598_vm12, %v1537_v11  ;;  %v1648_v11 = vor.u32 %v1647_v16, %v1643_v53 }
 0x25d   : > { %1814 = vrot.lane.b32.xlu1 %v4491_v10, %s2653_s11  ;;  %v2489_v10 = vld [vmem:[%s4283_s1 + $0x8] sm:$0xff] }
 0x25e   : > { %1812 = vrot.lane.b32.xlu0 %v4492_v58, %s2653_s11  ;;  %1798 = vrot.lane.b32.xlu2 %v3252_v17, %s2653_s11  ;;  %v2488_v58 = vld [vmem:[%s4283_s1] sm:$0xff]  ;;  %v4510_v17 = vld [vmem:[#allocation28_spill] sm:$0xff] }
 0x25f   : > { %v1527_v63 = vpop.permute.xlu1 %1526  ;;  %2495 = vmatpush.bf16.msra.mxu2 %v2489_v10  ;;  %2496 = vmatpush.bf16.msra.mxu3 %v2489_v10 }
 0x260   : > { %1611 = vst.msk [vmem:[#allocation2 + $0x30] sm:$0xf] %vm1598_vm12, %v1527_v63  ;;  %v1525_v43 = vpop.permute.xlu0 %1524  ;;  %v1688_v38 = vpop.permute.xlu2 %1687  ;;  %2116 = vmatpush.bf16.msra.mxu0 %v2489_v10  ;;  %2494 = vmatpush.bf16.msra.mxu1 %v2489_v10  ;;  %v1649_v10 = vrot.slane %v1648_v11, 4 }
 0x261   : > { %1610 = vst.msk [vmem:[#allocation2 + $0x2c] sm:$0xf] %vm1598_vm12, %v1525_v43  ;;  %v4523_v43 = vld [vmem:[#allocation49_spill] sm:$0xff] }
 0x263   : > { %2498 = vmatpush.bf16.msra.mxu2 %v2488_v58  ;;  %2499 = vmatpush.bf16.msra.mxu3 %v2488_v58 }
 0x264   : > { %2117 = vmatpush.bf16.msra.mxu0 %v2488_v58  ;;  %2497 = vmatpush.bf16.msra.mxu1 %v2488_v58 }
 0x265   : > { %1558 = vrot.lane.b32.xlu1 %v3568_v24, %s2651_s9 }
 0x266   : > { %1544 = vrot.lane.b32.xlu0 %v4510_v17, %s2651_s9  ;;  %1542 = vrot.lane.b32.xlu2 %v4511_v40, %s2651_s9  ;;  %v1787_v17 = vrot.slane %v236_v8, 5  ;;  %v4525_v40 = vld [vmem:[#allocation35_spill] sm:$0xff] }
 0x267   : > { %v1535_v23 = vpop.permute.xlu1 %1534 }
 0x268   : > { %1615 = vst.msk [vmem:[#allocation2 + $0x40] sm:$0xf] %vm1598_vm12, %v1535_v23  ;;  %v1531_v5 = vpop.permute.xlu0 %1530  ;;  %v1706_v24 = vpop.permute.xlu2 %1705  ;;  %v4524_v23 = vld [vmem:[#allocation42_spill] sm:$0xff] }
 0x269   : > { %1613 = vst.msk [vmem:[#allocation2 + $0x38] sm:$0xf] %vm1598_vm12, %v1531_v5 }
 0x26a   : > { %1768 = vst.msk [vmem:[#allocation2 + $0x40] sm:$0xf] %vm1751_vm14, %v1688_v38  ;;  %v1653_v38 = vrot.slane %v1651_v26, 5 }
 0x26c   : > { %v1654_v5 = vsel %vm2771_vm2, %v1649_v10, %v1653_v38 }
 0x26d   : > { %1697 = vrot.lane.b32.xlu1 %v4484_v6, %s2652_s10 }
 0x26e   : > { %1695 = vrot.lane.b32.xlu0 %v4512_v0, %s2652_s10  ;;  %1560 = vrot.lane.b32.xlu2 %v3583_v13, %s2651_s9  ;;  %v1789_v0 = vrot.slane %v1787_v17, 4 }
 0x26f   : > { %v1553_v49 = vpop.permute.xlu1 %1552 }
 0x270   : > { %1624 = vst.msk [vmem:[#allocation2 + $0x64] sm:$0xf] %vm1598_vm12, %v1553_v49  ;;  %v1551_v61 = vpop.permute.xlu0 %1550  ;;  %v1841_v35 = vpop.permute.xlu2 %1840  ;;  %v1790_v49 = vrot.slane %v237_v55, 5 }
 0x271   : > { %1623 = vst.msk [vmem:[#allocation2 + $0x60] sm:$0xf] %vm1598_vm12, %v1551_v61 }
 0x272   : > { %1777 = vst.msk [vmem:[#allocation2 + $0x64] sm:$0xf] %vm1751_vm14, %v1706_v24 }
 0x275   : > { %1832 = vrot.lane.b32.xlu1 %v3434_v52, %s2653_s11 }
 0x276   : > { %1713 = vrot.lane.b32.xlu0 %v3682_v34, %s2652_s10  ;;  %1711 = vrot.lane.b32.xlu2 %v3686_v15, %s2652_s10 }
 0x277   : > { %v1704_v6 = vpop.permute.xlu1 %1703 }
 0x278   : > { %1776 = vst.msk [vmem:[#allocation2 + $0x60] sm:$0xf] %vm1751_vm14, %v1704_v6  ;;  %v1690_v48 = vpop.permute.xlu0 %1689  ;;  %v1658_v13 = vpop.permute.xlu2 %1657 }
 0x279   : > { %1769 = vst.msk [vmem:[#allocation2 + $0x44] sm:$0xf] %vm1751_vm14, %v1690_v48  ;;  %v1791_v48 = vsel %vm3158_vm6, %v1789_v0, %v1790_v49 }
 0x27a   : > { %1913 = vst.msk [vmem:[#allocation2 + $0x60] sm:$0xf] %vm1888_vm15, %v1841_v35  ;;  %v2378_v35 = vrot.slane %v4029_v30, 9 }
 0x27b   : > { %1753 = vst.msk [vmem:[#allocation2 + $0x4] sm:$0xf] %vm1751_vm14, %v1658_v13  ;;  %v4526_v13 = vld [vmem:[#allocation18_spill] sm:$0xff] }
 0x27d   : > { %1850 = vrot.lane.b32.xlu1 %v3792_v59, %s2653_s11 }
 0x27e   : > { %1848 = vrot.lane.b32.xlu0 %v3799_v57, %s2653_s11  ;;  %1834 = vrot.lane.b32.xlu2 %v3427_v14, %s2653_s11 }
 0x27f   : > { %v1827_v52 = vpop.permute.xlu1 %1826 }
 0x280   : > { %1906 = vst.msk [vmem:[#allocation2 + $0x44] sm:$0xf] %vm1888_vm15, %v1827_v52  ;;  %v1825_v34 = vpop.permute.xlu0 %1824  ;;  %v1793_v15 = vpop.permute.xlu2 %1792  ;;  %v1788_v52 = vsel %vm3158_vm6, %v2378_v35, %v1787_v17 }
 0x281   : > { %1905 = vst.msk [vmem:[#allocation2 + $0x40] sm:$0xf] %vm1888_vm15, %v1825_v34 }
 0x285   : > { %1679 = vrot.lane.b32.xlu1 %v4513_v51, %s2652_s10 }
 0x286   : > { %1665 = vrot.lane.b32.xlu0 %v4514_v60, %s2652_s10  ;;  %1663 = vrot.lane.b32.xlu2 %v4515_v36, %s2652_s10  ;;  %v4527_v60 = vld [vmem:[#allocation33_spill] sm:$0xff] }
 0x287   : > { %v1656_v59 = vpop.permute.xlu1 %1655 }
 0x288   : > { %1752 = vst.msk [vmem:[#allocation2] sm:$0xf] %vm1751_vm14, %v1656_v59  ;;  %v1843_v57 = vpop.permute.xlu0 %1842  ;;  %v2480_v54 = vld [vmem:[#allocation2 + $0x40] sm:$0xff]  ;;  %v1811_v14 = vpop.permute.xlu2 %1810  ;;  %v4528_v59 = vld [vmem:[#allocation21_spill] sm:$0xff] }
 0x289   : > { %1914 = vst.msk [vmem:[#allocation2 + $0x64] sm:$0xf] %vm1888_vm15, %v1843_v57  ;;  %2459 = vmatmul.msk.bf16.vlgmr.msra.gmra.mxu2 %vm2057_vm0, %v2480_v54 }
 0x28a   : > { %1889 = vst.msk [vmem:[#allocation2] sm:$0xf] %vm1888_vm15, %v1793_v15 }
 0x28d   : > { %1802 = vrot.lane.b32.xlu1 %v4485_v1, %s2653_s11  ;;  %v1632_v1 = vshrl.u32 %v4029_v30, 16 }
 0x28e   : > { %1800 = vrot.lane.b32.xlu0 %v4486_v45, %s2653_s11  ;;  %1681 = vrot.lane.b32.xlu2 %v4516_v28, %s2652_s10  ;;  %v1635_v45 = vshll.u32 %v4029_v30, 16 }
 0x28f   : > { %v1674_v44 = vpop.permute.xlu1 %1673  ;;  %v1634_v27 = vrot.slane %v1632_v1, 4  ;;  %v4532_v1 = vld [vmem:[#allocation32_spill] sm:$0xff] }
 0x290   : > { %1761 = vst.msk [vmem:[#allocation2 + $0x24] sm:$0xf] %vm1751_vm14, %v1674_v44  ;;  %v1672_v41 = vpop.permute.xlu0 %1671  ;;  %v2484_v62 = vld [vmem:[#allocation2 + $0x60] sm:$0xff]  ;;  %v1555_v4 = vpop.permute.xlu2 %1554  ;;  %v1637_v9 = vrot.slane %v1635_v45, 5 }
 0x291   : > { %1760 = vst.msk [vmem:[#allocation2 + $0x20] sm:$0xf] %vm1751_vm14, %v1672_v41  ;;  %2463 = vmatmul.msk.bf16.vlgmr.msra.gmra.mxu3 %vm2057_vm0, %v2484_v62  ;;  %v4531_v41 = vld [vmem:[#allocation52_spill] sm:$0xff] }
 0x292   : > { %1898 = vst.msk [vmem:[#allocation2 + $0x24] sm:$0xf] %vm1888_vm15, %v1811_v14  ;;  %v1638_v31 = vor.u32 %v1637_v9, %v1634_v27  ;;  %v4529_v14 = vld [vmem:[#allocation14_spill] sm:$0xff] }
 0x293   : > { %1625 = vst.msk [vmem:[#allocation2 + $0x68] sm:$0xf] %vm1598_vm12, %v1555_v4  ;;  %v4533_v4 = vld [vmem:[#allocation57_spill] sm:$0xff]  ;;  %v4534_v9 = vld [vmem:[#allocation58_spill] sm:$0xff] }
 0x294   : > { %v1639_v50 = vrot.slane %v1638_v31, 4 }
 0x295   : > { %1546 = vrot.lane.b32.xlu1 %v4517_v12, %s2651_s9 }
 0x296   : > { %1818 = vrot.lane.b32.xlu0 %v4518_v25, %s2653_s11  ;;  %1816 = vrot.lane.b32.xlu2 %v4519_v3, %s2653_s11  ;;  %v1644_v19 = vsel %vm2771_vm2, %v1639_v50, %v1643_v53 }
 0x297   : > { %v1809_v37 = vpop.permute.xlu1 %1808 }
 0x298   : > { %1897 = vst.msk [vmem:[#allocation2 + $0x20] sm:$0xf] %vm1888_vm15, %v1809_v37  ;;  %v1795_v2 = vpop.permute.xlu0 %1794  ;;  %v1694_v42 = vpop.permute.xlu2 %1693 }
 0x299   : > { %1890 = vst.msk [vmem:[#allocation2 + $0x4] sm:$0xf] %vm1888_vm15, %v1795_v2 }
 0x29d   : > { %1564 = vrot.lane.b32.xlu1 %v236_v8, %s2651_s9 }
 0x29e   : > { %1562 = vrot.lane.b32.xlu0 %v4029_v30, %s2651_s9  ;;  %1548 = vrot.lane.b32.xlu2 %v4520_v21, %s2651_s9  ;;  %v4530_v30 = vld [vmem:[#allocation51_spill] sm:$0xff] }
 0x29f   : > { %v1541_v56 = vpop.permute.xlu1 %1540  ;;  %v2476_v39 = vld [vmem:[#allocation2 + $0x20] sm:$0xff] }
 0x2a0   : > { %1618 = vst.msk [vmem:[#allocation2 + $0x4c] sm:$0xf] %vm1598_vm12, %v1541_v56  ;;  %v1539_v29 = vpop.permute.xlu0 %1538  ;;  %v2472_v46 = vld [vmem:[#allocation2] sm:$0xff]  ;;  %2455 = vmatmul.msk.bf16.vlgmr.msra.gmra.mxu1 %vm2057_vm0, %v2476_v39  ;;  %v1829_v7 = vpop.permute.xlu2 %1828 }
 0x2a1   : > { %1617 = vst.msk [vmem:[#allocation2 + $0x48] sm:$0xf] %vm1598_vm12, %v1539_v29  ;;  %2451 = vmatmul.msk.bf16.vlgmr.msra.gmra.mxu0 %vm2057_vm0, %v2472_v46 }
 0x2a2   : > { %1771 = vst.msk [vmem:[#allocation2 + $0x4c] sm:$0xf] %vm1751_vm14, %v1694_v42 }
 0x2a5   : > { %1715 = vrot.lane.b32.xlu1 %v1644_v19, %s2652_s10 }
 0x2a6   : > { %1701 = vrot.lane.b32.xlu0 %v4522_v18, %s2652_s10  ;;  %1699 = vrot.lane.b32.xlu2 %v4523_v43, %s2652_s10  ;;  %v4148_v43 = vld [vmem:[%s4284_s2] ss:$0 sm:$0xff] }
 0x2a7   : > { %v1692_v32 = vpop.permute.xlu1 %1691 }
 0x2a8   : > { %1770 = vst.msk [vmem:[#allocation2 + $0x48] sm:$0xf] %vm1751_vm14, %v1692_v32  ;;  %v1557_v63 = vpop.permute.xlu0 %1556  ;;  %v1847_v58 = vpop.permute.xlu2 %1846 }
 0x2a9   : > { %1626 = vst.msk [vmem:[#allocation2 + $0x6c] sm:$0xf] %vm1598_vm12, %v1557_v63 }
 0x2aa   : > { %1907 = vst.msk [vmem:[#allocation2 + $0x48] sm:$0xf] %vm1888_vm15, %v1829_v7 }
 0x2ad   : > { %1838 = vrot.lane.b32.xlu1 %v4524_v23, %s2653_s11 }
 0x2ae   : > { %1836 = vrot.lane.b32.xlu0 %v4525_v40, %s2653_s11  ;;  %1717 = vrot.lane.b32.xlu2 %v1654_v5, %s2652_s10 }
 0x2af   : > { %v1710_v24 = vpop.permute.xlu1 %1709 }
 0x2b0   : > { %1779 = vst.msk [vmem:[#allocation2 + $0x6c] sm:$0xf] %vm1751_vm14, %v1710_v24  ;;  %v1708_v61 = vpop.permute.xlu0 %1707  ;;  %v1676_v6 = vpop.permute.xlu2 %1675 }
 0x2b1   : > { %1778 = vst.msk [vmem:[#allocation2 + $0x68] sm:$0xf] %vm1751_vm14, %v1708_v61 }
 0x2b2   : > { %1916 = vst.msk [vmem:[#allocation2 + $0x6c] sm:$0xf] %vm1888_vm15, %v1847_v58 }
 0x2b3   : > { %1762 = vst.msk [vmem:[#allocation2 + $0x28] sm:$0xf] %vm1751_vm14, %v1676_v6 }
 0x2b5   : > { %1532 = vrot.lane.b32.xlu1 %v4526_v13, %s2651_s9 }
 0x2b6   : > { %1854 = vrot.lane.b32.xlu0 %v1791_v48, %s2653_s11  ;;  %1852 = vrot.lane.b32.xlu2 %v1788_v52, %s2653_s11 }
 0x2b7   : > { %v1845_v34 = vpop.permute.xlu1 %1844 }
 0x2b8   : > { %1915 = vst.msk [vmem:[#allocation2 + $0x68] sm:$0xf] %vm1888_vm15, %v1845_v34  ;;  %v1831_v15 = vpop.permute.xlu0 %1830  ;;  %v1799_v51 = vpop.permute.xlu2 %1798 }
 0x2b9   : > { %1908 = vst.msk [vmem:[#allocation2 + $0x4c] sm:$0xf] %vm1888_vm15, %v1831_v15 }
 0x2bd   : > { %1683 = vrot.lane.b32.xlu1 %v4527_v60, %s2652_s10 }
 0x2be   : > { %1669 = vrot.lane.b32.xlu0 %v4528_v59, %s2652_s10  ;;  %1667 = vrot.lane.b32.xlu2 %v4529_v14, %s2652_s10 }
 0x2bf   : > { %v1662_v57 = vpop.permute.xlu1 %1661  ;;  %v2485_v47 = vld [vmem:[#allocation2 + $0x68] sm:$0xff] }
 0x2c0   : > { %1755 = vst.msk [vmem:[#allocation2 + $0xc] sm:$0xf] %vm1751_vm14, %v1662_v57  ;;  %v1660_v54 = vpop.permute.xlu0 %1659  ;;  %v2481_v36 = vld [vmem:[#allocation2 + $0x48] sm:$0xff]  ;;  %2464 = vmatmul.msk.bf16.gmra.mxu3 %vm2057_vm0, %v2485_v47  ;;  %v1543_v44 = vpop.permute.xlu2 %1542 }
 0x2c1   : > { %1754 = vst.msk [vmem:[#allocation2 + $0x8] sm:$0xf] %vm1751_vm14, %v1660_v54  ;;  %2460 = vmatmul.msk.bf16.gmra.mxu2 %vm2057_vm0, %v2481_v36 }
 0x2c2   : > { %1892 = vst.msk [vmem:[#allocation2 + $0xc] sm:$0xf] %vm1888_vm15, %v1799_v51 }
 0x2c3   : > { %1619 = vst.msk [vmem:[#allocation2 + $0x50] sm:$0xf] %vm1598_vm12, %v1543_v44 }
 0x2c5   : > { %1806 = vrot.lane.b32.xlu1 %v4530_v30, %s2653_s11 }
 0x2c6   : > { %1804 = vrot.lane.b32.xlu0 %v4531_v41, %s2653_s11  ;;  %1685 = vrot.lane.b32.xlu2 %v4532_v1, %s2652_s10  ;;  %s2277_s10 = scalar_lea.hbm %s4285_s3, %s2490_s7 }
 0x2c7   : > { %v1797_v62 = vpop.permute.xlu1 %1796  ;;  %s2280_s18 = sshll.u32 %s2277_s10, 4  ;;  %s2281_s18 = int_to_ptr.hbm [resolvable:$true] %s2280_s18 }
 0x2c8   : > { %1891 = vst.msk [vmem:[#allocation2 + $0x8] sm:$0xf] %vm1888_vm15, %v1797_v62  ;;  %v1678_v28 = vpop.permute.xlu0 %1677  ;;  %v1561_v45 = vpop.permute.xlu2 %1560  ;;  %s2580_s19 = sshra.s32 %s2281_s18, 4  ;;  %s2581_s19 = int_to_ptr.hbm [resolvable:$true] %s2580_s19 }
 0x2c9   : > { %1763 = vst.msk [vmem:[#allocation2 + $0x2c] sm:$0xf] %vm1751_vm14, %v1678_v28  ;;  %s2582_s21 = scalar_lea.hbm %s2581_s19, 256  ;;  %p2587_p1 = scmp.lt.s32.totalorder %s2581_s19, %s4285_s3 }
 0x2ca   : > { %1628 = vst.msk [vmem:[#allocation2 + $0x74] sm:$0xf] %vm1598_vm12, %v1561_v45  ;;  %p2583_p12 = scmp.ne.s32.totalorder %s2581_s19, %s2582_s21  ;;  %p2588_p2 = scmp.lt.s32.totalorder %s2586_s27, %s2582_s21 }
 0x2cc   : > { %p2584_p13 = pnand %p2583_p12, %p2715_p4  ;;  %p2589_p3 = por %p2588_p2, %p2587_p1 }
 0x2ce   : > { %1822 = vrot.lane.b32.xlu0 %v4533_v4, %s2653_s11  ;;  %1820 = vrot.lane.b32.xlu2 %v4534_v9, %s2653_s11  ;;  %s2278_s11 = sshll.u32 %s4156_s6, 4  ;;  %p2585_p0 = pneg %p2584_p13  ;;  %s2279_s11 = int_to_ptr.vmem [resolvable:$true] %s2278_s11 }
 0x2cf   : > { %v1815_v12 = vpop.permute.xlu1 %1814  ;;  %v2473_v25 = vld [vmem:[#allocation2 + $0x8] sm:$0xff] }
 0x2d0   : > { %1900 = vst.msk [vmem:[#allocation2 + $0x2c] sm:$0xf] %vm1888_vm15, %v1815_v12  ;;  %v1813_v27 = vpop.permute.xlu0 %1812  ;;  %2452 = vmatmul.msk.bf16.gmra.mxu0 %vm2057_vm0, %v2473_v25  ;;  %v1712_v37 = vpop.permute.xlu2 %1711  ;;  %p2590_p5 = pnand %p2589_p3, %p2585_p0 }
 0x2d1   : > { %1899 = vst.msk [vmem:[#allocation2 + $0x28] sm:$0xf] %vm1888_vm15, %v1813_v27 }
 0x2d7   : > { %v1559_v2 = vpop.permute.xlu1 %1558 }
 0x2d8   : > { %1627 = vst.msk [vmem:[#allocation2 + $0x70] sm:$0xf] %vm1598_vm12, %v1559_v2  ;;  %v1545_v3 = vpop.permute.xlu0 %1544  ;;  %v2477_v8 = vld [vmem:[#allocation2 + $0x28] sm:$0xff]  ;;  %v1835_v22 = vpop.permute.xlu2 %1834 }
 0x2d9   : > { %1620 = vst.msk [vmem:[#allocation2 + $0x54] sm:$0xf] %vm1598_vm12, %v1545_v3  ;;  %2456 = vmatmul.msk.bf16.gmra.mxu1 %vm2057_vm0, %v2477_v8 }
 0x2da   : > { %1780 = vst.msk [vmem:[#allocation2 + $0x70] sm:$0xf] %vm1751_vm14, %v1712_v37 }
 0x2df   : > { %v1698_v31 = vpop.permute.xlu1 %1697 }
 0x2e0   : > { %1773 = vst.msk [vmem:[#allocation2 + $0x54] sm:$0xf] %vm1751_vm14, %v1698_v31  ;;  %v1696_v42 = vpop.permute.xlu0 %1695  ;;  %v1664_v20 = vpop.permute.xlu2 %1663 }
 0x2e1   : > { %1772 = vst.msk [vmem:[#allocation2 + $0x50] sm:$0xf] %vm1751_vm14, %v1696_v42 }
 0x2e2   : > { %1910 = vst.msk [vmem:[#allocation2 + $0x54] sm:$0xf] %vm1888_vm15, %v1835_v22 }
 0x2e3   : > { %1756 = vst.msk [vmem:[#allocation2 + $0x10] sm:$0xf] %vm1751_vm14, %v1664_v20 }
 0x2e7   : > { %v1833_v50 = vpop.permute.xlu1 %1832 }
 0x2e8   : > { %1909 = vst.msk [vmem:[#allocation2 + $0x50] sm:$0xf] %vm1888_vm15, %v1833_v50  ;;  %v1714_v53 = vpop.permute.xlu0 %1713  ;;  %v1682_v56 = vpop.permute.xlu2 %1681 }
 0x2e9   : > { %1781 = vst.msk [vmem:[#allocation2 + $0x74] sm:$0xf] %vm1751_vm14, %v1714_v53 }
 0x2ea   : > { %1765 = vst.msk [vmem:[#allocation2 + $0x34] sm:$0xf] %vm1751_vm14, %v1682_v56 }
 0x2ef   : > { %v1851_v39 = vpop.permute.xlu1 %1850  ;;  %v2482_v29 = vld [vmem:[#allocation2 + $0x50] sm:$0xff] }
 0x2f0   : > { %1918 = vst.msk [vmem:[#allocation2 + $0x74] sm:$0xf] %vm1888_vm15, %v1851_v39  ;;  %v1849_v46 = vpop.permute.xlu0 %1848  ;;  %2461 = vmatmul.msk.bf16.gmra.mxu2 %vm2057_vm0, %v2482_v29  ;;  %v1817_v21 = vpop.permute.xlu2 %1816 }
 0x2f1   : > { %1917 = vst.msk [vmem:[#allocation2 + $0x70] sm:$0xf] %vm1888_vm15, %v1849_v46 }
 0x2f7   : > { %v1680_v16 = vpop.permute.xlu1 %1679 }
 0x2f8   : > { %1764 = vst.msk [vmem:[#allocation2 + $0x30] sm:$0xf] %vm1751_vm14, %v1680_v16  ;;  %v1666_v33 = vpop.permute.xlu0 %1665  ;;  %v2486_v19 = vld [vmem:[#allocation2 + $0x70] sm:$0xff]  ;;  %v1549_v7 = vpop.permute.xlu2 %1548 }
 0x2f9   : > { %1757 = vst.msk [vmem:[#allocation2 + $0x14] sm:$0xf] %vm1751_vm14, %v1666_v33  ;;  %2465 = vmatmul.msk.bf16.gmra.mxu3 %vm2057_vm0, %v2486_v19 }
 0x2fa   : > { %1901 = vst.msk [vmem:[#allocation2 + $0x30] sm:$0xf] %vm1888_vm15, %v1817_v21 }
 0x2fb   : > { %1622 = vst.msk [vmem:[#allocation2 + $0x5c] sm:$0xf] %vm1598_vm12, %v1549_v7 }
 0x2ff   : > { %v1803_v55 = vpop.permute.xlu1 %1802 }
 0x300   : > { %1894 = vst.msk [vmem:[#allocation2 + $0x14] sm:$0xf] %vm1888_vm15, %v1803_v55  ;;  %v1801_v11 = vpop.permute.xlu0 %1800  ;;  %v1700_v26 = vpop.permute.xlu2 %1699 }
 0x301   : > { %1893 = vst.msk [vmem:[#allocation2 + $0x10] sm:$0xf] %vm1888_vm15, %v1801_v11 }
 0x307   : > { %v1547_v18 = vpop.permute.xlu1 %1546 }
 0x308   : > { %1621 = vst.msk [vmem:[#allocation2 + $0x58] sm:$0xf] %vm1598_vm12, %v1547_v18  ;;  %v1819_v32 = vpop.permute.xlu0 %1818  ;;  %v2474_v63 = vld [vmem:[#allocation2 + $0x10] sm:$0xff]  ;;  %v1718_v10 = vpop.permute.xlu2 %1717 }
 0x309   : > { %1902 = vst.msk [vmem:[#allocation2 + $0x34] sm:$0xf] %vm1888_vm15, %v1819_v32  ;;  %2453 = vmatmul.msk.bf16.gmra.mxu0 %vm2057_vm0, %v2474_v63 }
 0x30a   : > { %1774 = vst.msk [vmem:[#allocation2 + $0x58] sm:$0xf] %vm1751_vm14, %v1700_v26 }
 0x30c   : > { %v2159_v38 = vpop.f32.mrf.mxu2 }
 0x30d   : > { %v2160_v58 = vadd.f32 %v4148_v43, %v2159_v38 }
 0x30f   : > { %v1565_v17 = vpop.permute.xlu1 %1564  ;;  %v2215_v23 = vmax.f32 %v2160_v58, 0.0 }
 0x310   : > { %1630 = vst.msk [vmem:[#allocation2 + $0x7c] sm:$0xf] %vm1598_vm12, %v1565_v17  ;;  %v1563_v5 = vpop.permute.xlu0 %1562  ;;  %v2478_v40 = vld [vmem:[#allocation2 + $0x30] sm:$0xff]  ;;  %v1853_v24 = vpop.permute.xlu2 %1852 }
 0x311   : > { %1629 = vst.msk [vmem:[#allocation2 + $0x78] sm:$0xf] %vm1598_vm12, %v1563_v5  ;;  %2457 = vmatmul.msk.bf16.gmra.mxu1 %vm2057_vm0, %v2478_v40 }
 0x312   : > { %2247 = vst [vmem:[%s4156_s6 + $0x80] sm:$0xff] %v2215_v23 }
 0x313   : > { %1783 = vst.msk [vmem:[#allocation2 + $0x7c] sm:$0xf] %vm1751_vm14, %v1718_v10 }
 0x314   : > { %v2161_v0 = vpop.f32.mrf.mxu2  ;;  %v2179_v49 = vpop.f32.mrf.mxu3 }
 0x315   : > { %v2162_v61 = vadd.f32 %v4148_v43, %v2161_v0  ;;  %v2180_v35 = vadd.f32 %v4148_v43, %v2179_v49 }
 0x317   : > { %v1716_v6 = vpop.permute.xlu1 %1715  ;;  %v2216_v48 = vmax.f32 %v2162_v61, 0.0  ;;  %v2223_v13 = vmax.f32 %v2180_v35, 0.0 }
 0x318   : > { %1782 = vst.msk [vmem:[#allocation2 + $0x78] sm:$0xf] %vm1751_vm14, %v1716_v6  ;;  %v1702_v52 = vpop.permute.xlu0 %1701  ;;  %v1668_v34 = vpop.permute.xlu2 %1667 }
 0x319   : > { %1775 = vst.msk [vmem:[#allocation2 + $0x5c] sm:$0xf] %vm1751_vm14, %v1702_v52 }
 0x31a   : > { %2248 = vst [vmem:[%s4156_s6 + $0x88] sm:$0xff] %v2216_v48 }
 0x31b   : > { %2255 = vst [vmem:[%s4156_s6 + $0xc0] sm:$0xff] %v2223_v13 }
 0x31c   : > { %1919 = vst.msk [vmem:[#allocation2 + $0x78] sm:$0xf] %vm1888_vm15, %v1853_v24  ;;  %v2181_v15 = vpop.f32.mrf.mxu3 }
 0x31d   : > { %1758 = vst.msk [vmem:[#allocation2 + $0x18] sm:$0xf] %vm1751_vm14, %v1668_v34  ;;  %v2182_v51 = vadd.f32 %v4148_v43, %v2181_v15  ;;  %v2139_v60 = vpop.f32.mrf.mxu1 }
 0x31e   : > { %v2140_v57 = vadd.f32 %v4148_v43, %v2139_v60  ;;  %v2119_v47 = vpop.f32.mrf.mxu0 }
 0x31f   : > { %v1839_v59 = vpop.permute.xlu1 %1838  ;;  %v2224_v54 = vmax.f32 %v2182_v51, 0.0  ;;  %v2120_v14 = vadd.f32 %v4148_v43, %v2119_v47 }
 0x320   : > { %1912 = vst.msk [vmem:[#allocation2 + $0x5c] sm:$0xf] %vm1888_vm15, %v1839_v59  ;;  %v1837_v36 = vpop.permute.xlu0 %1836  ;;  %v2207_v44 = vmax.f32 %v2140_v57, 0.0  ;;  %v1686_v41 = vpop.permute.xlu2 %1685 }
 0x321   : > { %1911 = vst.msk [vmem:[#allocation2 + $0x58] sm:$0xf] %vm1888_vm15, %v1837_v36  ;;  %v2199_v30 = vmax.f32 %v2120_v14, 0.0 }
 0x322   : > { %2256 = vst [vmem:[%s4156_s6 + $0xc8] sm:$0xff] %v2224_v54 }
 0x323   : > { %2239 = vst [vmem:[%s4156_s6 + $0x40] sm:$0xff] %v2207_v44 }
 0x324   : > { %2231 = vst [vmem:[%s4156_s6] sm:$0xff] %v2199_v30 }
 0x325   : > { %v2141_v62 = vpop.f32.mrf.mxu1 }
 0x326   : > { %v2142_v1 = vadd.f32 %v4148_v43, %v2141_v62  ;;  %v2121_v45 = vpop.f32.mrf.mxu0 }
 0x327   : > { %v1533_v28 = vpop.permute.xlu1 %1532  ;;  %v2122_v12 = vadd.f32 %v4148_v43, %v2121_v45 }
 0x328   : > { %1614 = vst.msk [vmem:[#allocation2 + $0x3c] sm:$0xf] %vm1598_vm12, %v1533_v28  ;;  %v1855_v4 = vpop.permute.xlu0 %1854  ;;  %v2483_v25 = vld [vmem:[#allocation2 + $0x58] sm:$0xff]  ;;  %v2208_v27 = vmax.f32 %v2142_v1, 0.0  ;;  %v1821_v2 = vpop.permute.xlu2 %1820 }
 0x329   : > { %1920 = vst.msk [vmem:[#allocation2 + $0x7c] sm:$0xf] %vm1888_vm15, %v1855_v4  ;;  %v2200_v9 = vmax.f32 %v2122_v12, 0.0  ;;  %2462 = vmatmul.msk.bf16.gmra.mxu2 %vm2057_vm0, %v2483_v25 }
 0x32a   : > { %1767 = vst.msk [vmem:[#allocation2 + $0x3c] sm:$0xf] %vm1751_vm14, %v1686_v41 }
 0x32b   : > { %2240 = vst [vmem:[%s4156_s6 + $0x48] sm:$0xff] %v2208_v27 }
 0x32c   : > { %2232 = vst [vmem:[%s4156_s6 + $0x8] sm:$0xff] %v2200_v9 }
 0x32f   : > { %v1684_v37 = vpop.permute.xlu1 %1683 }
 0x330   : > { %1766 = vst.msk [vmem:[#allocation2 + $0x38] sm:$0xf] %vm1751_vm14, %v1684_v37  ;;  %v1670_v3 = vpop.permute.xlu0 %1669  ;;  %v2487_v8 = vld [vmem:[#allocation2 + $0x78] sm:$0xff] }
 0x331   : > { %1759 = vst.msk [vmem:[#allocation2 + $0x1c] sm:$0xf] %vm1751_vm14, %v1670_v3  ;;  %2466 = vmatmul.msk.bf16.gmra.mxu3 %vm2057_vm0, %v2487_v8 }
 0x332   : > { %1903 = vst.msk [vmem:[#allocation2 + $0x38] sm:$0xf] %vm1888_vm15, %v1821_v2 }
 0x337   : > { %v1807_v22 = vpop.permute.xlu1 %1806 }
 0x338   : > { %1896 = vst.msk [vmem:[#allocation2 + $0x1c] sm:$0xf] %vm1888_vm15, %v1807_v22  ;;  %v1805_v31 = vpop.permute.xlu0 %1804 }
 0x339   : > { %1895 = vst.msk [vmem:[#allocation2 + $0x18] sm:$0xf] %vm1888_vm15, %v1805_v31 }
 0x340   : > { %v1823_v42 = vpop.permute.xlu0 %1822  ;;  %v2475_v20 = vld [vmem:[#allocation2 + $0x18] sm:$0xff] }
 0x341   : > { %1904 = vst.msk [vmem:[#allocation2 + $0x3c] sm:$0xf] %vm1888_vm15, %v1823_v42  ;;  %2454 = vmatmul.msk.bf16.gmra.mxu0 %vm2057_vm0, %v2475_v20 }
 0x343   : > { %v2184_v50 = vpop.f32.mrf.mxu3 }
 0x344   : > { %v2164_v53 = vpop.f32.mrf.mxu2  ;;  %v2185_v56 = vadd.f32 %v4148_v43, %v2184_v50 }
 0x345   : > { %v2165_v39 = vadd.f32 %v4148_v43, %v2164_v53 }
 0x346   : > { %v2225_v29 = vmax.f32 %v2185_v56, 0.0 }
 0x347   : > { %v2217_v46 = vmax.f32 %v2165_v39, 0.0 }
 0x348   : > { %v2479_v21 = vld [vmem:[#allocation2 + $0x38] sm:$0xff]  ;;  %2257 = vst [vmem:[%s4156_s6 + $0xd0] sm:$0xff] %v2225_v29 }
 0x349   : > { %2249 = vst [vmem:[%s4156_s6 + $0x90] sm:$0xff] %v2217_v46  ;;  %2458 = vmatmul.msk.bf16.gmra.mxu1 %vm2057_vm0, %v2479_v21 }
 0x34b   : > { %v2186_v16 = vpop.f32.mrf.mxu3 }
 0x34c   : > { %v2166_v33 = vpop.f32.mrf.mxu2  ;;  %v2187_v19 = vadd.f32 %v4148_v43, %v2186_v16 }
 0x34d   : > { %v2167_v7 = vadd.f32 %v4148_v43, %v2166_v33  ;;  %v2124_v55 = vpop.f32.mrf.mxu0 }
 0x34e   : > { %v2226_v11 = vmax.f32 %v2187_v19, 0.0  ;;  %v2125_v26 = vadd.f32 %v4148_v43, %v2124_v55 }
 0x34f   : > { %v2218_v18 = vmax.f32 %v2167_v7, 0.0 }
 0x350   : > { %2258 = vst [vmem:[%s4156_s6 + $0xd8] sm:$0xff] %v2226_v11  ;;  %v2201_v32 = vmax.f32 %v2125_v26, 0.0 }
 0x351   : > { %2250 = vst [vmem:[%s4156_s6 + $0x98] sm:$0xff] %v2218_v18 }
 0x352   : > { %2233 = vst [vmem:[%s4156_s6 + $0x10] sm:$0xff] %v2201_v32 }
 0x355   : > { %v2126_v63 = vpop.f32.mrf.mxu0 }
 0x356   : > { %v2127_v10 = vadd.f32 %v4148_v43, %v2126_v63  ;;  %v2144_v38 = vpop.f32.mrf.mxu1 }
 0x357   : > { %v2145_v58 = vadd.f32 %v4148_v43, %v2144_v38 }
 0x358   : > { %v2202_v17 = vmax.f32 %v2127_v10, 0.0 }
 0x359   : > { %v2209_v23 = vmax.f32 %v2145_v58, 0.0 }
 0x35a   : > { %2234 = vst [vmem:[%s4156_s6 + $0x18] sm:$0xff] %v2202_v17 }
 0x35b   : > { %2241 = vst [vmem:[%s4156_s6 + $0x50] sm:$0xff] %v2209_v23 }
 0x35e   : > { %v2146_v5 = vpop.f32.mrf.mxu1 }
 0x35f   : > { %v2147_v40 = vadd.f32 %v4148_v43, %v2146_v5 }
 0x361   : > { %v2210_v24 = vmax.f32 %v2147_v40, 0.0 }
 0x363   : > { %2242 = vst [vmem:[%s4156_s6 + $0x58] sm:$0xff] %v2210_v24 }
 0x373   : > { %v2169_v0 = vpop.f32.mrf.mxu2 }
 0x374   : > { %v2170_v49 = vadd.f32 %v4148_v43, %v2169_v0 }
 0x376   : > { %v2219_v61 = vmax.f32 %v2170_v49, 0.0 }
 0x378   : > { %2251 = vst [vmem:[%s4156_s6 + $0xa0] sm:$0xff] %v2219_v61 }
 0x37b   : > { %v2171_v35 = vpop.f32.mrf.mxu2 }
 0x37c   : > { %v2172_v6 = vadd.f32 %v4148_v43, %v2171_v35  ;;  %v2189_v48 = vpop.f32.mrf.mxu3 }
 0x37d   : > { %v2190_v13 = vadd.f32 %v4148_v43, %v2189_v48 }
 0x37e   : > { %v2220_v52 = vmax.f32 %v2172_v6, 0.0 }
 0x37f   : > { %v2227_v34 = vmax.f32 %v2190_v13, 0.0 }
 0x380   : > { %2252 = vst [vmem:[%s4156_s6 + $0xa8] sm:$0xff] %v2220_v52 }
 0x381   : > { %2259 = vst [vmem:[%s4156_s6 + $0xe0] sm:$0xff] %v2227_v34 }
 0x384   : > { %v2191_v15 = vpop.f32.mrf.mxu3 }
 0x385   : > { %v2192_v51 = vadd.f32 %v4148_v43, %v2191_v15 }
 0x386   : > { %v2129_v60 = vpop.f32.mrf.mxu0 }
 0x387   : > { %v2228_v59 = vmax.f32 %v2192_v51, 0.0  ;;  %v2130_v57 = vadd.f32 %v4148_v43, %v2129_v60 }
 0x389   : > { %2260 = vst [vmem:[%s4156_s6 + $0xe8] sm:$0xff] %v2228_v59  ;;  %v2203_v47 = vmax.f32 %v2130_v57, 0.0 }
 0x38b   : > { %2235 = vst [vmem:[%s4156_s6 + $0x20] sm:$0xff] %v2203_v47 }
 0x38e   : > { %v2131_v54 = vpop.f32.mrf.mxu0  ;;  %v2149_v36 = vpop.f32.mrf.mxu1 }
 0x38f   : > { %v2132_v14 = vadd.f32 %v4148_v43, %v2131_v54  ;;  %v2150_v44 = vadd.f32 %v4148_v43, %v2149_v36 }
 0x391   : > { %v2204_v30 = vmax.f32 %v2132_v14, 0.0  ;;  %v2211_v41 = vmax.f32 %v2150_v44, 0.0 }
 0x393   : > { %2236 = vst [vmem:[%s4156_s6 + $0x28] sm:$0xff] %v2204_v30 }
 0x394   : > { %2243 = vst [vmem:[%s4156_s6 + $0x60] sm:$0xff] %v2211_v41 }
 0x396   : > { %v2151_v62 = vpop.f32.mrf.mxu1 }
 0x397   : > { %v2152_v28 = vadd.f32 %v4148_v43, %v2151_v62 }
 0x399   : > { %v2212_v1 = vmax.f32 %v2152_v28, 0.0 }
 0x39b   : > { %2244 = vst [vmem:[%s4156_s6 + $0x68] sm:$0xff] %v2212_v1 }
 0x3ac   : > { %v2174_v45 = vpop.f32.mrf.mxu2 }
 0x3ad   : > { %v2175_v4 = vadd.f32 %v4148_v43, %v2174_v45 }
 0x3af   : > { %v2221_v12 = vmax.f32 %v2175_v4, 0.0 }
 0x3b1   : > { %2253 = vst [vmem:[%s4156_s6 + $0xb0] sm:$0xff] %v2221_v12 }
 0x3b4   : > { %v2176_v25 = vpop.f32.mrf.mxu2  ;;  %v2194_v27 = vpop.f32.mrf.mxu3 }
 0x3b5   : > { %v2177_v9 = vadd.f32 %v4148_v43, %v2176_v25  ;;  %v2195_v37 = vadd.f32 %v4148_v43, %v2194_v27 }
 0x3b7   : > { %v2222_v2 = vmax.f32 %v2177_v9, 0.0  ;;  %v2229_v3 = vmax.f32 %v2195_v37, 0.0 }
 0x3b9   : > { %2254 = vst [vmem:[%s4156_s6 + $0xb8] sm:$0xff] %v2222_v2 }
 0x3ba   : > { %2261 = vst [vmem:[%s4156_s6 + $0xf0] sm:$0xff] %v2229_v3 }
 0x3bc   : > { %v2196_v8 = vpop.f32.mrf.mxu3 }
 0x3bd   : > { %v2197_v22 = vadd.f32 %v4148_v43, %v2196_v8 }
 0x3be   : > { %v2134_v31 = vpop.f32.mrf.mxu0 }
 0x3bf   : > { %v2230_v42 = vmax.f32 %v2197_v22, 0.0  ;;  %v2135_v20 = vadd.f32 %v4148_v43, %v2134_v31 }
 0x3c1   : > { %2262 = vst [vmem:[%s4156_s6 + $0xf8] sm:$0xff] %v2230_v42  ;;  %v2205_v50 = vmax.f32 %v2135_v20, 0.0 }
 0x3c3   : > { %2237 = vst [vmem:[%s4156_s6 + $0x30] sm:$0xff] %v2205_v50 }
 0x3c6   : > { %v2136_v53 = vpop.f32.mrf.mxu0  ;;  %v2154_v56 = vpop.f32.mrf.mxu1 }
 0x3c7   : > { %v2137_v39 = vadd.f32 %v4148_v43, %v2136_v53  ;;  %v2155_v29 = vadd.f32 %v4148_v43, %v2154_v56 }
 0x3c9   : > { %v2206_v46 = vmax.f32 %v2137_v39, 0.0  ;;  %v2213_v21 = vmax.f32 %v2155_v29, 0.0 }
 0x3cb   : > { %2238 = vst [vmem:[%s4156_s6 + $0x38] sm:$0xff] %v2206_v46 }
 0x3cc   : > { %2245 = vst [vmem:[%s4156_s6 + $0x70] sm:$0xff] %v2213_v21 }
 0x3ce   : > { %v2156_v16 = vpop.f32.mrf.mxu1 }
 0x3cf   : > { %v2157_v33 = vadd.f32 %v4148_v43, %v2156_v16 }
 0x3d1   : > { %v2214_v19 = vmax.f32 %v2157_v33, 0.0 }
 0x3d3   : > { %2246 = vst [vmem:[%s4156_s6 + $0x78] sm:$0xff] %v2214_v19 }
 0x3d4   : > { %2593 = shalt.err (!%p2590_p5)
}
 0x3d5   : > { %s2654_s28 = smov 128  }
 0x3d6   : > { %2501 = dma.vmem_to_hbm [thread:$0]  (%p2715_p4), %s2279_s11, 4096, %s2281_s18, %s2264_s15, %s2654_s28, %s2654_s28, %s2647_s5  }
 0x3d7 PF: > { %p2507_p6 = scmp.ge.s32.totalorder %s2644_s17, 2  ;;  %s2295_s4 = sand.u32 1, %s2624_s12  }
 0x3d8   : > { %s2296_s6 = scalar_lea.sflag [#allocation4], %s2295_s4 }
 0x3d9   : > { %p2504_p7 = pnand %p2507_p6, %p2722_p8 }
 0x3db   : > { %p2505_p9 = pneg %p2504_p7 }
 0x3dd   : > { %2619 = dma.done.wait (%p2505_p9), %s2296_s6, 4096  }
 0x3de   : > { %2621 = vsyncadd (%p2505_p9), %s2296_s6, 4294963200  ;;  %s16_s17 = sadd.s32 1, %s2644_s17   ;;  %s4535_s12 = smov %s2628_s13 }
 0x3df   : > { %p13_p10 = scmp.ge.s32.totalorder %s16_s17, 4   ;;  %s4536_s13 = smov %s2632_s14 }
 0x3e0   : > { %s4537_s14 = smov %s2728_s25  ;;  %s4538_s15 = smov %s2640_s16 }
 0x3e1   : > { %s4539_s16 = smov %s4541_s20  ;;  %15 = sbr.rel (!%p13_p10) target bundleno = 4 (0x4), region = 67 }
 0x3e6   :  { %2302 = vsyncpa [#allocation4], 1 }
 0x3e7   :  { %2304 = vsyncpa [#allocation4 + $0x1], 1 }

</bundles_post_ra>
